<compile_context>
chip_gen: v7x
topology: tpu7x:2x2x1
jax: 0.10.0
libtpu: 0.0.40
codegen_flags: <defaults>
</compile_context>

<pallas_src>
import random

import numpy as np
import jax
import jax.numpy as jnp
from jax.experimental import pallas as pl
from jax.experimental.pallas import tpu as pltpu


def _round_up(x, m):
    return (x + m - 1) // m * m


def mean_aggregate(neighbor_idx, counts, features, *, tile_rows=8):
    """Neighbor-mean aggregation (the gather+mean part of MeanAggregator).

    neighbor_idx: (n_out, num_sample) int; only the first counts[i] entries of
                  row i are used (padding values are ignored / remapped).
    counts:       (n_out,) int, number of valid entries per row (clamped >= 1).
    features:     (num_nodes, d) float.
    Returns:      (n_out, d) in features.dtype.
    """
    n_out, num_sample = neighbor_idx.shape
    num_nodes, d = features.shape
    dtype = features.dtype

    # Lane-dense feature axis (pad only if d % 128 != 0) plus one all-zero
    # dummy row so padded neighbor slots contribute exactly 0 to the sum.
    d_pad = _round_up(d, 128)
    zero_row = num_nodes                              # index of the dummy row
    n_rows = _round_up(num_nodes + 1, 8)              # sublane-friendly rows
    feat = jnp.zeros((n_rows, d_pad), dtype)
    feat = feat.at[:num_nodes, :d].set(features)

    # Remap padding slots to the zero row and pad the output axis to a whole
    # number of row tiles.
    counts = jnp.maximum(counts.astype(jnp.int32), 1)          # guard div-by-0
    slot = jnp.arange(num_sample, dtype=jnp.int32)[None, :]
    idx = jnp.where(slot < counts[:, None],
                    neighbor_idx.astype(jnp.int32), zero_row)
    n_out_pad = _round_up(n_out, tile_rows)
    if n_out_pad != n_out:
        idx = jnp.concatenate(
            [idx, jnp.full((n_out_pad - n_out, num_sample), zero_row, jnp.int32)],
            axis=0)
        counts = jnp.concatenate(
            [counts, jnp.ones((n_out_pad - n_out,), jnp.int32)], axis=0)
    idx_flat = idx.reshape(-1)
    # TODO(synk): idx_flat lives in SMEM (scalar prefetch); for very large
    # n_out * num_sample chunk the call or stream index slices from HBM.

    # VMEM budget: table is double-buffered by the pipeline; stay well inside
    # v7x's 64 MiB physical VMEM.
    table_bytes = int(n_rows) * int(d_pad) * jnp.dtype(dtype).itemsize
    out_tile_bytes = tile_rows * d_pad * jnp.dtype(dtype).itemsize
    vmem_needed = 2 * table_bytes + 2 * out_tile_bytes + (1 << 20)
    assert vmem_needed <= 48 * 1024 * 1024, (
        "feature table too large for the VMEM-resident gather path")
    # TODO(synk): for larger tables fall back to an HBM gather path
    # (features in memory_space=pl.ANY + double-buffered pltpu.make_async_copy).
    vmem_limit = min(48 * 1024 * 1024, max(vmem_needed, 32 * 1024 * 1024))

    def kernel(idx_ref, cnt_ref, feat_ref, o_ref):
        t = pl.program_id(0)
        base = t * tile_rows
        for r in range(tile_rows):            # static -> unrolled at trace time
            row = base + r
            acc = jnp.zeros((1, d_pad), jnp.float32)
            for s in range(num_sample):
                nid = idx_ref[row * num_sample + s]
                acc = acc + feat_ref[pl.ds(nid, 1), :].astype(jnp.float32)
            inv = 1.0 / cnt_ref[row].astype(jnp.float32)
            o_ref[r:r + 1, :] = (acc * inv).astype(o_ref.dtype)

    cost = pl.CostEstimate(
        flops=2 * n_out_pad * num_sample * d_pad,
        transcendentals=0,
        bytes_accessed=table_bytes
        + n_out_pad * d_pad * jnp.dtype(dtype).itemsize
        + 4 * (n_out_pad * num_sample + n_out_pad),
    )

    out = pl.pallas_call(
        kernel,
        out_shape=jax.ShapeDtypeStruct((n_out_pad, d_pad), dtype),
        grid_spec=pltpu.PrefetchScalarGridSpec(
            num_scalar_prefetch=2,
            grid=(n_out_pad // tile_rows,),
            in_specs=[pl.BlockSpec((n_rows, d_pad), lambda t, *_: (0, 0))],
            out_specs=pl.BlockSpec((tile_rows, d_pad), lambda t, *_: (t, 0)),
        ),
        compiler_params=pltpu.CompilerParams(
            dimension_semantics=("parallel",),
            vmem_limit_bytes=vmem_limit),
        cost_estimate=cost,
    )(idx_flat, counts, feat)

    return out[:n_out, :d]


def build_neighbor_index(nodes, adj_lists, num_sample, seed=0):
    """Host glue mirroring MeanAggregator.forward's sampling (deterministic).

    Returns (idx[n_out, num_sample] int32, counts[n_out] int32, sampled lists).
    Padding entries in idx are arbitrary (the kernel wrapper remaps them to a
    dummy zero row using counts).
    """
    rng = random.Random(seed)
    n_out = len(nodes)
    idx = np.zeros((n_out, num_sample), dtype=np.int32)
    counts = np.zeros((n_out,), dtype=np.int32)
    sampled_per_node = []
    for i, node in enumerate(nodes):
        neighbor_ids = list(adj_lists[node])
        if len(neighbor_ids) == 0:
            sampled = [node]            # features[node].unsqueeze(0).mean(0)
        elif len(neighbor_ids) > num_sample:
            sampled = rng.sample(neighbor_ids, num_sample)
        else:
            sampled = neighbor_ids
        k = len(sampled)
        idx[i, :k] = sampled
        idx[i, k:] = node               # placeholder; remapped by the wrapper
        counts[i] = k
        sampled_per_node.append(sampled)
    return idx, counts, sampled_per_node


if __name__ == "__main__":
    # Synthetic deterministic graph.
    num_nodes = 64
    feature_dim = 32
    num_sample = 10
    nodes = list(range(16))             # aggregate for the first 16 nodes

    graph_rng = random.Random(123)
    adj_lists = {}
    for n in range(num_nodes):
        deg = graph_rng.randint(0, 15)
        if n == 3:
            deg = 0                     # exercise the "no neighbors" branch
        adj_lists[n] = graph_rng.sample(range(num_nodes), deg) if deg > 0 else []

    # Deterministic node features.
    key = jax.random.PRNGKey(0)
    features = jax.random.normal(key, (num_nodes, feature_dim), dtype=jnp.float32)

    # Host glue: deterministic neighbor sampling -> index table + counts.
    idx_np, counts_np, sampled_per_node = build_neighbor_index(
        nodes, adj_lists, num_sample, seed=0)

    # Run the Pallas gather-mean kernel.
    out = mean_aggregate(jnp.asarray(idx_np), jnp.asarray(counts_np), features)
    out = jax.block_until_ready(out)

    # Reference: explicit gather + mean (same semantics as the torch loop).
    feats_np = np.asarray(features)
    ref = np.stack(
        [feats_np[s].mean(axis=0) for s in sampled_per_node]
    ).astype(np.float32)

    np.testing.assert_allclose(np.asarray(out), ref, rtol=1e-5, atol=1e-5)
    assert out.shape == (len(nodes), feature_dim)
    print("KERNEL_OK")
</pallas_src>

<mosaic_0001>
module attributes {stable_mosaic.version = 11 : i64} {
  func.func @kernel(%arg0: i32, %arg1: memref<160xi32, #tpu.memory_space<smem>>, %arg2: memref<16xi32, #tpu.memory_space<smem>>, %arg3: memref<72x128xf32, #tpu.memory_space<vmem>>, %arg4: memref<8x128xf32, #tpu.memory_space<vmem>>) attributes {dimension_semantics = [#tpu.dimension_semantics<parallel>], iteration_bounds = array<i64: 2>, scalar_prefetch = 2 : i64, scratch_operands = 0 : i64, tpu.core_type = #tpu.core_type<tc>, window_params = [{pipeline_mode = #tpu.pipeline_mode<synchronous>, transform_indices = @transform_0, window_bounds = array<i64: 72, 128>}, {transform_indices = @transform_1, window_bounds = array<i64: 8, 128>}]} {
    %c8_i32 = arith.constant 8 : i32
    %0 = arith.muli %arg0, %c8_i32 : i32
    %c0_i32 = arith.constant 0 : i32
    %1 = arith.addi %0, %c0_i32 : i32
    %cst = arith.constant 0.000000e+00 : f32
    %2 = vector.broadcast %cst : f32 to vector<1x128xf32>
    %c10_i32 = arith.constant 10 : i32
    %3 = arith.muli %1, %c10_i32 : i32
    %c0_i32_0 = arith.constant 0 : i32
    %4 = arith.addi %3, %c0_i32_0 : i32
    %5 = arith.index_cast %4 : i32 to index
    %6 = memref.load %arg1[%5] : memref<160xi32, #tpu.memory_space<smem>>
    %7 = arith.index_cast %6 : i32 to index
    %c0 = arith.constant 0 : index
    %8 = vector.load %arg3[%7, %c0] : memref<72x128xf32, #tpu.memory_space<vmem>>, vector<1x128xf32>
    %9 = arith.addf %2, %8 : vector<1x128xf32>
    %c10_i32_1 = arith.constant 10 : i32
    %10 = arith.muli %1, %c10_i32_1 : i32
    %c1_i32 = arith.constant 1 : i32
    %11 = arith.addi %10, %c1_i32 : i32
    %12 = arith.index_cast %11 : i32 to index
    %13 = memref.load %arg1[%12] : memref<160xi32, #tpu.memory_space<smem>>
    %14 = arith.index_cast %13 : i32 to index
    %c0_2 = arith.constant 0 : index
    %15 = vector.load %arg3[%14, %c0_2] : memref<72x128xf32, #tpu.memory_space<vmem>>, vector<1x128xf32>
    %16 = arith.addf %9, %15 : vector<1x128xf32>
    %c10_i32_3 = arith.constant 10 : i32
    %17 = arith.muli %1, %c10_i32_3 : i32
    %c2_i32 = arith.constant 2 : i32
    %18 = arith.addi %17, %c2_i32 : i32
    %19 = arith.index_cast %18 : i32 to index
    %20 = memref.load %arg1[%19] : memref<160xi32, #tpu.memory_space<smem>>
    %21 = arith.index_cast %20 : i32 to index
    %c0_4 = arith.constant 0 : index
    %22 = vector.load %arg3[%21, %c0_4] : memref<72x128xf32, #tpu.memory_space<vmem>>, vector<1x128xf32>
    %23 = arith.addf %16, %22 : vector<1x128xf32>
    %c10_i32_5 = arith.constant 10 : i32
    %24 = arith.muli %1, %c10_i32_5 : i32
    %c3_i32 = arith.constant 3 : i32
    %25 = arith.addi %24, %c3_i32 : i32
    %26 = arith.index_cast %25 : i32 to index
    %27 = memref.load %arg1[%26] : memref<160xi32, #tpu.memory_space<smem>>
    %28 = arith.index_cast %27 : i32 to index
    %c0_6 = arith.constant 0 : index
    %29 = vector.load %arg3[%28, %c0_6] : memref<72x128xf32, #tpu.memory_space<vmem>>, vector<1x128xf32>
    %30 = arith.addf %23, %29 : vector<1x128xf32>
    %c10_i32_7 = arith.constant 10 : i32
    %31 = arith.muli %1, %c10_i32_7 : i32
    %c4_i32 = arith.constant 4 : i32
    %32 = arith.addi %31, %c4_i32 : i32
    %33 = arith.index_cast %32 : i32 to index
    %34 = memref.load %arg1[%33] : memref<160xi32, #tpu.memory_space<smem>>
    %35 = arith.index_cast %34 : i32 to index
    %c0_8 = arith.constant 0 : index
    %36 = vector.load %arg3[%35, %c0_8] : memref<72x128xf32, #tpu.memory_space<vmem>>, vector<1x128xf32>
    %37 = arith.addf %30, %36 : vector<1x128xf32>
    %c10_i32_9 = arith.constant 10 : i32
    %38 = arith.muli %1, %c10_i32_9 : i32
    %c5_i32 = arith.constant 5 : i32
    %39 = arith.addi %38, %c5_i32 : i32
    %40 = arith.index_cast %39 : i32 to index
    %41 = memref.load %arg1[%40] : memref<160xi32, #tpu.memory_space<smem>>
    %42 = arith.index_cast %41 : i32 to index
    %c0_10 = arith.constant 0 : index
    %43 = vector.load %arg3[%42, %c0_10] : memref<72x128xf32, #tpu.memory_space<vmem>>, vector<1x128xf32>
    %44 = arith.addf %37, %43 : vector<1x128xf32>
    %c10_i32_11 = arith.constant 10 : i32
    %45 = arith.muli %1, %c10_i32_11 : i32
    %c6_i32 = arith.constant 6 : i32
    %46 = arith.addi %45, %c6_i32 : i32
    %47 = arith.index_cast %46 : i32 to index
    %48 = memref.load %arg1[%47] : memref<160xi32, #tpu.memory_space<smem>>
    %49 = arith.index_cast %48 : i32 to index
    %c0_12 = arith.constant 0 : index
    %50 = vector.load %arg3[%49, %c0_12] : memref<72x128xf32, #tpu.memory_space<vmem>>, vector<1x128xf32>
    %51 = arith.addf %44, %50 : vector<1x128xf32>
    %c10_i32_13 = arith.constant 10 : i32
    %52 = arith.muli %1, %c10_i32_13 : i32
    %c7_i32 = arith.constant 7 : i32
    %53 = arith.addi %52, %c7_i32 : i32
    %54 = arith.index_cast %53 : i32 to index
    %55 = memref.load %arg1[%54] : memref<160xi32, #tpu.memory_space<smem>>
    %56 = arith.index_cast %55 : i32 to index
    %c0_14 = arith.constant 0 : index
    %57 = vector.load %arg3[%56, %c0_14] : memref<72x128xf32, #tpu.memory_space<vmem>>, vector<1x128xf32>
    %58 = arith.addf %51, %57 : vector<1x128xf32>
    %c10_i32_15 = arith.constant 10 : i32
    %59 = arith.muli %1, %c10_i32_15 : i32
    %c8_i32_16 = arith.constant 8 : i32
    %60 = arith.addi %59, %c8_i32_16 : i32
    %61 = arith.index_cast %60 : i32 to index
    %62 = memref.load %arg1[%61] : memref<160xi32, #tpu.memory_space<smem>>
    %63 = arith.index_cast %62 : i32 to index
    %c0_17 = arith.constant 0 : index
    %64 = vector.load %arg3[%63, %c0_17] : memref<72x128xf32, #tpu.memory_space<vmem>>, vector<1x128xf32>
    %65 = arith.addf %58, %64 : vector<1x128xf32>
    %c10_i32_18 = arith.constant 10 : i32
    %66 = arith.muli %1, %c10_i32_18 : i32
    %c9_i32 = arith.constant 9 : i32
    %67 = arith.addi %66, %c9_i32 : i32
    %68 = arith.index_cast %67 : i32 to index
    %69 = memref.load %arg1[%68] : memref<160xi32, #tpu.memory_space<smem>>
    %70 = arith.index_cast %69 : i32 to index
    %c0_19 = arith.constant 0 : index
    %71 = vector.load %arg3[%70, %c0_19] : memref<72x128xf32, #tpu.memory_space<vmem>>, vector<1x128xf32>
    %72 = arith.addf %65, %71 : vector<1x128xf32>
    %73 = arith.index_cast %1 : i32 to index
    %74 = memref.load %arg2[%73] : memref<16xi32, #tpu.memory_space<smem>>
    %75 = arith.sitofp %74 : i32 to f32
    %cst_20 = arith.constant 1.000000e+00 : f32
    %76 = arith.divf %cst_20, %75 : f32
    %77 = vector.broadcast %76 : f32 to vector<1x128xf32>
    %78 = arith.mulf %72, %77 : vector<1x128xf32>
    %c0_21 = arith.constant 0 : index
    %c0_22 = arith.constant 0 : index
    %79 = vector.load %arg4[%c0_21, %c0_22] : memref<8x128xf32, #tpu.memory_space<vmem>>, vector<1x128xf32>
    tpu.vector_store %arg4[%c0_21, %c0_22], %78 {strides = array<i32>} : memref<8x128xf32, #tpu.memory_space<vmem>>, vector<1x128xf32>,
    %c1_i32_23 = arith.constant 1 : i32
    %80 = arith.addi %0, %c1_i32_23 : i32
    %cst_24 = arith.constant 0.000000e+00 : f32
    %81 = vector.broadcast %cst_24 : f32 to vector<1x128xf32>
    %c10_i32_25 = arith.constant 10 : i32
    %82 = arith.muli %80, %c10_i32_25 : i32
    %c0_i32_26 = arith.constant 0 : i32
    %83 = arith.addi %82, %c0_i32_26 : i32
    %84 = arith.index_cast %83 : i32 to index
    %85 = memref.load %arg1[%84] : memref<160xi32, #tpu.memory_space<smem>>
    %86 = arith.index_cast %85 : i32 to index
    %c0_27 = arith.constant 0 : index
    %87 = vector.load %arg3[%86, %c0_27] : memref<72x128xf32, #tpu.memory_space<vmem>>, vector<1x128xf32>
    %88 = arith.addf %81, %87 : vector<1x128xf32>
    %c10_i32_28 = arith.constant 10 : i32
    %89 = arith.muli %80, %c10_i32_28 : i32
    %c1_i32_29 = arith.constant 1 : i32
    %90 = arith.addi %89, %c1_i32_29 : i32
    %91 = arith.index_cast %90 : i32 to index
    %92 = memref.load %arg1[%91] : memref<160xi32, #tpu.memory_space<smem>>
    %93 = arith.index_cast %92 : i32 to index
    %c0_30 = arith.constant 0 : index
    %94 = vector.load %arg3[%93, %c0_30] : memref<72x128xf32, #tpu.memory_space<vmem>>, vector<1x128xf32>
    %95 = arith.addf %88, %94 : vector<1x128xf32>
    %c10_i32_31 = arith.constant 10 : i32
    %96 = arith.muli %80, %c10_i32_31 : i32
    %c2_i32_32 = arith.constant 2 : i32
    %97 = arith.addi %96, %c2_i32_32 : i32
    %98 = arith.index_cast %97 : i32 to index
    %99 = memref.load %arg1[%98] : memref<160xi32, #tpu.memory_space<smem>>
    %100 = arith.index_cast %99 : i32 to index
    %c0_33 = arith.constant 0 : index
    %101 = vector.load %arg3[%100, %c0_33] : memref<72x128xf32, #tpu.memory_space<vmem>>, vector<1x128xf32>
    %102 = arith.addf %95, %101 : vector<1x128xf32>
    %c10_i32_34 = arith.constant 10 : i32
    %103 = arith.muli %80, %c10_i32_34 : i32
    %c3_i32_35 = arith.constant 3 : i32
    %104 = arith.addi %103, %c3_i32_35 : i32
    %105 = arith.index_cast %104 : i32 to index
    %106 = memref.load %arg1[%105] : memref<160xi32, #tpu.memory_space<smem>>
    %107 = arith.index_cast %106 : i32 to index
    %c0_36 = arith.constant 0 : index
    %108 = vector.load %arg3[%107, %c0_36] : memref<72x128xf32, #tpu.memory_space<vmem>>, vector<1x128xf32>
    %109 = arith.addf %102, %108 : vector<1x128xf32>
    %c10_i32_37 = arith.constant 10 : i32
    %110 = arith.muli %80, %c10_i32_37 : i32
    %c4_i32_38 = arith.constant 4 : i32
    %111 = arith.addi %110, %c4_i32_38 : i32
    %112 = arith.index_cast %111 : i32 to index
    %113 = memref.load %arg1[%112] : memref<160xi32, #tpu.memory_space<smem>>
    %114 = arith.index_cast %113 : i32 to index
    %c0_39 = arith.constant 0 : index
    %115 = vector.load %arg3[%114, %c0_39] : memref<72x128xf32, #tpu.memory_space<vmem>>, vector<1x128xf32>
    %116 = arith.addf %109, %115 : vector<1x128xf32>
    %c10_i32_40 = arith.constant 10 : i32
    %117 = arith.muli %80, %c10_i32_40 : i32
    %c5_i32_41 = arith.constant 5 : i32
    %118 = arith.addi %117, %c5_i32_41 : i32
    %119 = arith.index_cast %118 : i32 to index
    %120 = memref.load %arg1[%119] : memref<160xi32, #tpu.memory_space<smem>>
    %121 = arith.index_cast %120 : i32 to index
    %c0_42 = arith.constant 0 : index
    %122 = vector.load %arg3[%121, %c0_42] : memref<72x128xf32, #tpu.memory_space<vmem>>, vector<1x128xf32>
    %123 = arith.addf %116, %122 : vector<1x128xf32>
    %c10_i32_43 = arith.constant 10 : i32
    %124 = arith.muli %80, %c10_i32_43 : i32
    %c6_i32_44 = arith.constant 6 : i32
    %125 = arith.addi %124, %c6_i32_44 : i32
    %126 = arith.index_cast %125 : i32 to index
    %127 = memref.load %arg1[%126] : memref<160xi32, #tpu.memory_space<smem>>
    %128 = arith.index_cast %127 : i32 to index
    %c0_45 = arith.constant 0 : index
    %129 = vector.load %arg3[%128, %c0_45] : memref<72x128xf32, #tpu.memory_space<vmem>>, vector<1x128xf32>
    %130 = arith.addf %123, %129 : vector<1x128xf32>
    %c10_i32_46 = arith.constant 10 : i32
    %131 = arith.muli %80, %c10_i32_46 : i32
    %c7_i32_47 = arith.constant 7 : i32
    %132 = arith.addi %131, %c7_i32_47 : i32
    %133 = arith.index_cast %132 : i32 to index
    %134 = memref.load %arg1[%133] : memref<160xi32, #tpu.memory_space<smem>>
    %135 = arith.index_cast %134 : i32 to index
    %c0_48 = arith.constant 0 : index
    %136 = vector.load %arg3[%135, %c0_48] : memref<72x128xf32, #tpu.memory_space<vmem>>, vector<1x128xf32>
    %137 = arith.addf %130, %136 : vector<1x128xf32>
    %c10_i32_49 = arith.constant 10 : i32
    %138 = arith.muli %80, %c10_i32_49 : i32
    %c8_i32_50 = arith.constant 8 : i32
    %139 = arith.addi %138, %c8_i32_50 : i32
    %140 = arith.index_cast %139 : i32 to index
    %141 = memref.load %arg1[%140] : memref<160xi32, #tpu.memory_space<smem>>
    %142 = arith.index_cast %141 : i32 to index
    %c0_51 = arith.constant 0 : index
    %143 = vector.load %arg3[%142, %c0_51] : memref<72x128xf32, #tpu.memory_space<vmem>>, vector<1x128xf32>
    %144 = arith.addf %137, %143 : vector<1x128xf32>
    %c10_i32_52 = arith.constant 10 : i32
    %145 = arith.muli %80, %c10_i32_52 : i32
    %c9_i32_53 = arith.constant 9 : i32
    %146 = arith.addi %145, %c9_i32_53 : i32
    %147 = arith.index_cast %146 : i32 to index
    %148 = memref.load %arg1[%147] : memref<160xi32, #tpu.memory_space<smem>>
    %149 = arith.index_cast %148 : i32 to index
    %c0_54 = arith.constant 0 : index
    %150 = vector.load %arg3[%149, %c0_54] : memref<72x128xf32, #tpu.memory_space<vmem>>, vector<1x128xf32>
    %151 = arith.addf %144, %150 : vector<1x128xf32>
    %152 = arith.index_cast %80 : i32 to index
    %153 = memref.load %arg2[%152] : memref<16xi32, #tpu.memory_space<smem>>
    %154 = arith.sitofp %153 : i32 to f32
    %cst_55 = arith.constant 1.000000e+00 : f32
    %155 = arith.divf %cst_55, %154 : f32
    %156 = vector.broadcast %155 : f32 to vector<1x128xf32>
    %157 = arith.mulf %151, %156 : vector<1x128xf32>
    %c1 = arith.constant 1 : index
    %c0_56 = arith.constant 0 : index
    %158 = vector.load %arg4[%c1, %c0_56] : memref<8x128xf32, #tpu.memory_space<vmem>>, vector<1x128xf32>
    tpu.vector_store %arg4[%c1, %c0_56], %157 {strides = array<i32>} : memref<8x128xf32, #tpu.memory_space<vmem>>, vector<1x128xf32>,
    %c2_i32_57 = arith.constant 2 : i32
    %159 = arith.addi %0, %c2_i32_57 : i32
    %cst_58 = arith.constant 0.000000e+00 : f32
    %160 = vector.broadcast %cst_58 : f32 to vector<1x128xf32>
    %c10_i32_59 = arith.constant 10 : i32
    %161 = arith.muli %159, %c10_i32_59 : i32
    %c0_i32_60 = arith.constant 0 : i32
    %162 = arith.addi %161, %c0_i32_60 : i32
    %163 = arith.index_cast %162 : i32 to index
    %164 = memref.load %arg1[%163] : memref<160xi32, #tpu.memory_space<smem>>
    %165 = arith.index_cast %164 : i32 to index
    %c0_61 = arith.constant 0 : index
    %166 = vector.load %arg3[%165, %c0_61] : memref<72x128xf32, #tpu.memory_space<vmem>>, vector<1x128xf32>
    %167 = arith.addf %160, %166 : vector<1x128xf32>
    %c10_i32_62 = arith.constant 10 : i32
    %168 = arith.muli %159, %c10_i32_62 : i32
    %c1_i32_63 = arith.constant 1 : i32
    %169 = arith.addi %168, %c1_i32_63 : i32
    %170 = arith.index_cast %169 : i32 to index
    %171 = memref.load %arg1[%170] : memref<160xi32, #tpu.memory_space<smem>>
    %172 = arith.index_cast %171 : i32 to index
    %c0_64 = arith.constant 0 : index
    %173 = vector.load %arg3[%172, %c0_64] : memref<72x128xf32, #tpu.memory_space<vmem>>, vector<1x128xf32>
    %174 = arith.addf %167, %173 : vector<1x128xf32>
    %c10_i32_65 = arith.constant 10 : i32
    %175 = arith.muli %159, %c10_i32_65 : i32
    %c2_i32_66 = arith.constant 2 : i32
    %176 = arith.addi %175, %c2_i32_66 : i32
    %177 = arith.index_cast %176 : i32 to index
    %178 = memref.load %arg1[%177] : memref<160xi32, #tpu.memory_space<smem>>
    %179 = arith.index_cast %178 : i32 to index
    %c0_67 = arith.constant 0 : index
    %180 = vector.load %arg3[%179, %c0_67] : memref<72x128xf32, #tpu.memory_space<vmem>>, vector<1x128xf32>
    %181 = arith.addf %174, %180 : vector<1x128xf32>
    %c10_i32_68 = arith.constant 10 : i32
    %182 = arith.muli %159, %c10_i32_68 : i32
    %c3_i32_69 = arith.constant 3 : i32
    %183 = arith.addi %182, %c3_i32_69 : i32
    %184 = arith.index_cast %183 : i32 to index
    %185 = memref.load %arg1[%184] : memref<160xi32, #tpu.memory_space<smem>>
    %186 = arith.index_cast %185 : i32 to index
    %c0_70 = arith.constant 0 : index
    %187 = vector.load %arg3[%186, %c0_70] : memref<72x128xf32, #tpu.memory_space<vmem>>, vector<1x128xf32>
    %188 = arith.addf %181, %187 : vector<1x128xf32>
    %c10_i32_71 = arith.constant 10 : i32
    %189 = arith.muli %159, %c10_i32_71 : i32
    %c4_i32_72 = arith.constant 4 : i32
    %190 = arith.addi %189, %c4_i32_72 : i32
    %191 = arith.index_cast %190 : i32 to index
    %192 = memref.load %arg1[%191] : memref<160xi32, #tpu.memory_space<smem>>
    %193 = arith.index_cast %192 : i32 to index
    %c0_73 = arith.constant 0 : index
    %194 = vector.load %arg3[%193, %c0_73] : memref<72x128xf32, #tpu.memory_space<vmem>>, vector<1x128xf32>
    %195 = arith.addf %188, %194 : vector<1x128xf32>
    %c10_i32_74 = arith.constant 10 : i32
    %196 = arith.muli %159, %c10_i32_74 : i32
    %c5_i32_75 = arith.constant 5 : i32
    %197 = arith.addi %196, %c5_i32_75 : i32
    %198 = arith.index_cast %197 : i32 to index
    %199 = memref.load %arg1[%198] : memref<160xi32, #tpu.memory_space<smem>>
    %200 = arith.index_cast %199 : i32 to index
    %c0_76 = arith.constant 0 : index
    %201 = vector.load %arg3[%200, %c0_76] : memref<72x128xf32, #tpu.memory_space<vmem>>, vector<1x128xf32>
    %202 = arith.addf %195, %201 : vector<1x128xf32>
    %c10_i32_77 = arith.constant 10 : i32
    %203 = arith.muli %159, %c10_i32_77 : i32
    %c6_i32_78 = arith.constant 6 : i32
    %204 = arith.addi %203, %c6_i32_78 : i32
    %205 = arith.index_cast %204 : i32 to index
    %206 = memref.load %arg1[%205] : memref<160xi32, #tpu.memory_space<smem>>
    %207 = arith.index_cast %206 : i32 to index
    %c0_79 = arith.constant 0 : index
    %208 = vector.load %arg3[%207, %c0_79] : memref<72x128xf32, #tpu.memory_space<vmem>>, vector<1x128xf32>
    %209 = arith.addf %202, %208 : vector<1x128xf32>
    %c10_i32_80 = arith.constant 10 : i32
    %210 = arith.muli %159, %c10_i32_80 : i32
    %c7_i32_81 = arith.constant 7 : i32
    %211 = arith.addi %210, %c7_i32_81 : i32
    %212 = arith.index_cast %211 : i32 to index
    %213 = memref.load %arg1[%212] : memref<160xi32, #tpu.memory_space<smem>>
    %214 = arith.index_cast %213 : i32 to index
    %c0_82 = arith.constant 0 : index
    %215 = vector.load %arg3[%214, %c0_82] : memref<72x128xf32, #tpu.memory_space<vmem>>, vector<1x128xf32>
    %216 = arith.addf %209, %215 : vector<1x128xf32>
    %c10_i32_83 = arith.constant 10 : i32
    %217 = arith.muli %159, %c10_i32_83 : i32
    %c8_i32_84 = arith.constant 8 : i32
    %218 = arith.addi %217, %c8_i32_84 : i32
    %219 = arith.index_cast %218 : i32 to index
    %220 = memref.load %arg1[%219] : memref<160xi32, #tpu.memory_space<smem>>
    %221 = arith.index_cast %220 : i32 to index
    %c0_85 = arith.constant 0 : index
    %222 = vector.load %arg3[%221, %c0_85] : memref<72x128xf32, #tpu.memory_space<vmem>>, vector<1x128xf32>
    %223 = arith.addf %216, %222 : vector<1x128xf32>
    %c10_i32_86 = arith.constant 10 : i32
    %224 = arith.muli %159, %c10_i32_86 : i32
    %c9_i32_87 = arith.constant 9 : i32
    %225 = arith.addi %224, %c9_i32_87 : i32
    %226 = arith.index_cast %225 : i32 to index
    %227 = memref.load %arg1[%226] : memref<160xi32, #tpu.memory_space<smem>>
    %228 = arith.index_cast %227 : i32 to index
    %c0_88 = arith.constant 0 : index
    %229 = vector.load %arg3[%228, %c0_88] : memref<72x128xf32, #tpu.memory_space<vmem>>, vector<1x128xf32>
    %230 = arith.addf %223, %229 : vector<1x128xf32>
    %231 = arith.index_cast %159 : i32 to index
    %232 = memref.load %arg2[%231] : memref<16xi32, #tpu.memory_space<smem>>
    %233 = arith.sitofp %232 : i32 to f32
    %cst_89 = arith.constant 1.000000e+00 : f32
    %234 = arith.divf %cst_89, %233 : f32
    %235 = vector.broadcast %234 : f32 to vector<1x128xf32>
    %236 = arith.mulf %230, %235 : vector<1x128xf32>
    %c2 = arith.constant 2 : index
    %c0_90 = arith.constant 0 : index
    %237 = vector.load %arg4[%c2, %c0_90] : memref<8x128xf32, #tpu.memory_space<vmem>>, vector<1x128xf32>
    tpu.vector_store %arg4[%c2, %c0_90], %236 {strides = array<i32>} : memref<8x128xf32, #tpu.memory_space<vmem>>, vector<1x128xf32>,
    %c3_i32_91 = arith.constant 3 : i32
    %238 = arith.addi %0, %c3_i32_91 : i32
    %cst_92 = arith.constant 0.000000e+00 : f32
    %239 = vector.broadcast %cst_92 : f32 to vector<1x128xf32>
    %c10_i32_93 = arith.constant 10 : i32
    %240 = arith.muli %238, %c10_i32_93 : i32
    %c0_i32_94 = arith.constant 0 : i32
    %241 = arith.addi %240, %c0_i32_94 : i32
    %242 = arith.index_cast %241 : i32 to index
    %243 = memref.load %arg1[%242] : memref<160xi32, #tpu.memory_space<smem>>
    %244 = arith.index_cast %243 : i32 to index
    %c0_95 = arith.constant 0 : index
    %245 = vector.load %arg3[%244, %c0_95] : memref<72x128xf32, #tpu.memory_space<vmem>>, vector<1x128xf32>
    %246 = arith.addf %239, %245 : vector<1x128xf32>
    %c10_i32_96 = arith.constant 10 : i32
    %247 = arith.muli %238, %c10_i32_96 : i32
    %c1_i32_97 = arith.constant 1 : i32
    %248 = arith.addi %247, %c1_i32_97 : i32
    %249 = arith.index_cast %248 : i32 to index
    %250 = memref.load %arg1[%249] : memref<160xi32, #tpu.memory_space<smem>>
    %251 = arith.index_cast %250 : i32 to index
    %c0_98 = arith.constant 0 : index
    %252 = vector.load %arg3[%251, %c0_98] : memref<72x128xf32, #tpu.memory_space<vmem>>, vector<1x128xf32>
    %253 = arith.addf %246, %252 : vector<1x128xf32>
    %c10_i32_99 = arith.constant 10 : i32
    %254 = arith.muli %238, %c10_i32_99 : i32
    %c2_i32_100 = arith.constant 2 : i32
    %255 = arith.addi %254, %c2_i32_100 : i32
    %256 = arith.index_cast %255 : i32 to index
    %257 = memref.load %arg1[%256] : memref<160xi32, #tpu.memory_space<smem>>
    %258 = arith.index_cast %257 : i32 to index
    %c0_101 = arith.constant 0 : index
    %259 = vector.load %arg3[%258, %c0_101] : memref<72x128xf32, #tpu.memory_space<vmem>>, vector<1x128xf32>
    %260 = arith.addf %253, %259 : vector<1x128xf32>
    %c10_i32_102 = arith.constant 10 : i32
    %261 = arith.muli %238, %c10_i32_102 : i32
    %c3_i32_103 = arith.constant 3 : i32
    %262 = arith.addi %261, %c3_i32_103 : i32
    %263 = arith.index_cast %262 : i32 to index
    %264 = memref.load %arg1[%263] : memref<160xi32, #tpu.memory_space<smem>>
    %265 = arith.index_cast %264 : i32 to index
    %c0_104 = arith.constant 0 : index
    %266 = vector.load %arg3[%265, %c0_104] : memref<72x128xf32, #tpu.memory_space<vmem>>, vector<1x128xf32>
    %267 = arith.addf %260, %266 : vector<1x128xf32>
    %c10_i32_105 = arith.constant 10 : i32
    %268 = arith.muli %238, %c10_i32_105 : i32
    %c4_i32_106 = arith.constant 4 : i32
    %269 = arith.addi %268, %c4_i32_106 : i32
    %270 = arith.index_cast %269 : i32 to index
    %271 = memref.load %arg1[%270] : memref<160xi32, #tpu.memory_space<smem>>
    %272 = arith.index_cast %271 : i32 to index
    %c0_107 = arith.constant 0 : index
    %273 = vector.load %arg3[%272, %c0_107] : memref<72x128xf32, #tpu.memory_space<vmem>>, vector<1x128xf32>
    %274 = arith.addf %267, %273 : vector<1x128xf32>
    %c10_i32_108 = arith.constant 10 : i32
    %275 = arith.muli %238, %c10_i32_108 : i32
    %c5_i32_109 = arith.constant 5 : i32
    %276 = arith.addi %275, %c5_i32_109 : i32
    %277 = arith.index_cast %276 : i32 to index
    %278 = memref.load %arg1[%277] : memref<160xi32, #tpu.memory_space<smem>>
    %279 = arith.index_cast %278 : i32 to index
    %c0_110 = arith.constant 0 : index
    %280 = vector.load %arg3[%279, %c0_110] : memref<72x128xf32, #tpu.memory_space<vmem>>, vector<1x128xf32>
    %281 = arith.addf %274, %280 : vector<1x128xf32>
    %c10_i32_111 = arith.constant 10 : i32
    %282 = arith.muli %238, %c10_i32_111 : i32
    %c6_i32_112 = arith.constant 6 : i32
    %283 = arith.addi %282, %c6_i32_112 : i32
    %284 = arith.index_cast %283 : i32 to index
    %285 = memref.load %arg1[%284] : memref<160xi32, #tpu.memory_space<smem>>
    %286 = arith.index_cast %285 : i32 to index
    %c0_113 = arith.constant 0 : index
    %287 = vector.load %arg3[%286, %c0_113] : memref<72x128xf32, #tpu.memory_space<vmem>>, vector<1x128xf32>
    %288 = arith.addf %281, %287 : vector<1x128xf32>
    %c10_i32_114 = arith.constant 10 : i32
    %289 = arith.muli %238, %c10_i32_114 : i32
    %c7_i32_115 = arith.constant 7 : i32
    %290 = arith.addi %289, %c7_i32_115 : i32
    %291 = arith.index_cast %290 : i32 to index
    %292 = memref.load %arg1[%291] : memref<160xi32, #tpu.memory_space<smem>>
    %293 = arith.index_cast %292 : i32 to index
    %c0_116 = arith.constant 0 : index
    %294 = vector.load %arg3[%293, %c0_116] : memref<72x128xf32, #tpu.memory_space<vmem>>, vector<1x128xf32>
    %295 = arith.addf %288, %294 : vector<1x128xf32>
    %c10_i32_117 = arith.constant 10 : i32
    %296 = arith.muli %238, %c10_i32_117 : i32
    %c8_i32_118 = arith.constant 8 : i32
    %297 = arith.addi %296, %c8_i32_118 : i32
    %298 = arith.index_cast %297 : i32 to index
    %299 = memref.load %arg1[%298] : memref<160xi32, #tpu.memory_space<smem>>
    %300 = arith.index_cast %299 : i32 to index
    %c0_119 = arith.constant 0 : index
    %301 = vector.load %arg3[%300, %c0_119] : memref<72x128xf32, #tpu.memory_space<vmem>>, vector<1x128xf32>
    %302 = arith.addf %295, %301 : vector<1x128xf32>
    %c10_i32_120 = arith.constant 10 : i32
    %303 = arith.muli %238, %c10_i32_120 : i32
    %c9_i32_121 = arith.constant 9 : i32
    %304 = arith.addi %303, %c9_i32_121 : i32
    %305 = arith.index_cast %304 : i32 to index
    %306 = memref.load %arg1[%305] : memref<160xi32, #tpu.memory_space<smem>>
    %307 = arith.index_cast %306 : i32 to index
    %c0_122 = arith.constant 0 : index
    %308 = vector.load %arg3[%307, %c0_122] : memref<72x128xf32, #tpu.memory_space<vmem>>, vector<1x128xf32>
    %309 = arith.addf %302, %308 : vector<1x128xf32>
    %310 = arith.index_cast %238 : i32 to index
    %311 = memref.load %arg2[%310] : memref<16xi32, #tpu.memory_space<smem>>
    %312 = arith.sitofp %311 : i32 to f32
    %cst_123 = arith.constant 1.000000e+00 : f32
    %313 = arith.divf %cst_123, %312 : f32
    %314 = vector.broadcast %313 : f32 to vector<1x128xf32>
    %315 = arith.mulf %309, %314 : vector<1x128xf32>
    %c3 = arith.constant 3 : index
    %c0_124 = arith.constant 0 : index
    %316 = vector.load %arg4[%c3, %c0_124] : memref<8x128xf32, #tpu.memory_space<vmem>>, vector<1x128xf32>
    tpu.vector_store %arg4[%c3, %c0_124], %315 {strides = array<i32>} : memref<8x128xf32, #tpu.memory_space<vmem>>, vector<1x128xf32>,
    %c4_i32_125 = arith.constant 4 : i32
    %317 = arith.addi %0, %c4_i32_125 : i32
    %cst_126 = arith.constant 0.000000e+00 : f32
    %318 = vector.broadcast %cst_126 : f32 to vector<1x128xf32>
    %c10_i32_127 = arith.constant 10 : i32
    %319 = arith.muli %317, %c10_i32_127 : i32
    %c0_i32_128 = arith.constant 0 : i32
    %320 = arith.addi %319, %c0_i32_128 : i32
    %321 = arith.index_cast %320 : i32 to index
    %322 = memref.load %arg1[%321] : memref<160xi32, #tpu.memory_space<smem>>
    %323 = arith.index_cast %322 : i32 to index
    %c0_129 = arith.constant 0 : index
    %324 = vector.load %arg3[%323, %c0_129] : memref<72x128xf32, #tpu.memory_space<vmem>>, vector<1x128xf32>
    %325 = arith.addf %318, %324 : vector<1x128xf32>
    %c10_i32_130 = arith.constant 10 : i32
    %326 = arith.muli %317, %c10_i32_130 : i32
    %c1_i32_131 = arith.constant 1 : i32
    %327 = arith.addi %326, %c1_i32_131 : i32
    %328 = arith.index_cast %327 : i32 to index
    %329 = memref.load %arg1[%328] : memref<160xi32, #tpu.memory_space<smem>>
    %330 = arith.index_cast %329 : i32 to index
    %c0_132 = arith.constant 0 : index
    %331 = vector.load %arg3[%330, %c0_132] : memref<72x128xf32, #tpu.memory_space<vmem>>, vector<1x128xf32>
    %332 = arith.addf %325, %331 : vector<1x128xf32>
    %c10_i32_133 = arith.constant 10 : i32
    %333 = arith.muli %317, %c10_i32_133 : i32
    %c2_i32_134 = arith.constant 2 : i32
    %334 = arith.addi %333, %c2_i32_134 : i32
    %335 = arith.index_cast %334 : i32 to index
    %336 = memref.load %arg1[%335] : memref<160xi32, #tpu.memory_space<smem>>
    %337 = arith.index_cast %336 : i32 to index
    %c0_135 = arith.constant 0 : index
    %338 = vector.load %arg3[%337, %c0_135] : memref<72x128xf32, #tpu.memory_space<vmem>>, vector<1x128xf32>
    %339 = arith.addf %332, %338 : vector<1x128xf32>
    %c10_i32_136 = arith.constant 10 : i32
    %340 = arith.muli %317, %c10_i32_136 : i32
    %c3_i32_137 = arith.constant 3 : i32
    %341 = arith.addi %340, %c3_i32_137 : i32
    %342 = arith.index_cast %341 : i32 to index
    %343 = memref.load %arg1[%342] : memref<160xi32, #tpu.memory_space<smem>>
    %344 = arith.index_cast %343 : i32 to index
    %c0_138 = arith.constant 0 : index
    %345 = vector.load %arg3[%344, %c0_138] : memref<72x128xf32, #tpu.memory_space<vmem>>, vector<1x128xf32>
    %346 = arith.addf %339, %345 : vector<1x128xf32>
    %c10_i32_139 = arith.constant 10 : i32
    %347 = arith.muli %317, %c10_i32_139 : i32
    %c4_i32_140 = arith.constant 4 : i32
    %348 = arith.addi %347, %c4_i32_140 : i32
    %349 = arith.index_cast %348 : i32 to index
    %350 = memref.load %arg1[%349] : memref<160xi32, #tpu.memory_space<smem>>
    %351 = arith.index_cast %350 : i32 to index
    %c0_141 = arith.constant 0 : index
    %352 = vector.load %arg3[%351, %c0_141] : memref<72x128xf32, #tpu.memory_space<vmem>>, vector<1x128xf32>
    %353 = arith.addf %346, %352 : vector<1x128xf32>
    %c10_i32_142 = arith.constant 10 : i32
    %354 = arith.muli %317, %c10_i32_142 : i32
    %c5_i32_143 = arith.constant 5 : i32
    %355 = arith.addi %354, %c5_i32_143 : i32
    %356 = arith.index_cast %355 : i32 to index
    %357 = memref.load %arg1[%356] : memref<160xi32, #tpu.memory_space<smem>>
    %358 = arith.index_cast %357 : i32 to index
    %c0_144 = arith.constant 0 : index
    %359 = vector.load %arg3[%358, %c0_144] : memref<72x128xf32, #tpu.memory_space<vmem>>, vector<1x128xf32>
    %360 = arith.addf %353, %359 : vector<1x128xf32>
    %c10_i32_145 = arith.constant 10 : i32
    %361 = arith.muli %317, %c10_i32_145 : i32
    %c6_i32_146 = arith.constant 6 : i32
    %362 = arith.addi %361, %c6_i32_146 : i32
    %363 = arith.index_cast %362 : i32 to index
    %364 = memref.load %arg1[%363] : memref<160xi32, #tpu.memory_space<smem>>
    %365 = arith.index_cast %364 : i32 to index
    %c0_147 = arith.constant 0 : index
    %366 = vector.load %arg3[%365, %c0_147] : memref<72x128xf32, #tpu.memory_space<vmem>>, vector<1x128xf32>
    %367 = arith.addf %360, %366 : vector<1x128xf32>
    %c10_i32_148 = arith.constant 10 : i32
    %368 = arith.muli %317, %c10_i32_148 : i32
    %c7_i32_149 = arith.constant 7 : i32
    %369 = arith.addi %368, %c7_i32_149 : i32
    %370 = arith.index_cast %369 : i32 to index
    %371 = memref.load %arg1[%370] : memref<160xi32, #tpu.memory_space<smem>>
    %372 = arith.index_cast %371 : i32 to index
    %c0_150 = arith.constant 0 : index
    %373 = vector.load %arg3[%372, %c0_150] : memref<72x128xf32, #tpu.memory_space<vmem>>, vector<1x128xf32>
    %374 = arith.addf %367, %373 : vector<1x128xf32>
    %c10_i32_151 = arith.constant 10 : i32
    %375 = arith.muli %317, %c10_i32_151 : i32
    %c8_i32_152 = arith.constant 8 : i32
    %376 = arith.addi %375, %c8_i32_152 : i32
    %377 = arith.index_cast %376 : i32 to index
    %378 = memref.load %arg1[%377] : memref<160xi32, #tpu.memory_space<smem>>
    %379 = arith.index_cast %378 : i32 to index
    %c0_153 = arith.constant 0 : index
    %380 = vector.load %arg3[%379, %c0_153] : memref<72x128xf32, #tpu.memory_space<vmem>>, vector<1x128xf32>
    %381 = arith.addf %374, %380 : vector<1x128xf32>
    %c10_i32_154 = arith.constant 10 : i32
    %382 = arith.muli %317, %c10_i32_154 : i32
    %c9_i32_155 = arith.constant 9 : i32
    %383 = arith.addi %382, %c9_i32_155 : i32
    %384 = arith.index_cast %383 : i32 to index
    %385 = memref.load %arg1[%384] : memref<160xi32, #tpu.memory_space<smem>>
    %386 = arith.index_cast %385 : i32 to index
    %c0_156 = arith.constant 0 : index
    %387 = vector.load %arg3[%386, %c0_156] : memref<72x128xf32, #tpu.memory_space<vmem>>, vector<1x128xf32>
    %388 = arith.addf %381, %387 : vector<1x128xf32>
    %389 = arith.index_cast %317 : i32 to index
    %390 = memref.load %arg2[%389] : memref<16xi32, #tpu.memory_space<smem>>
    %391 = arith.sitofp %390 : i32 to f32
    %cst_157 = arith.constant 1.000000e+00 : f32
    %392 = arith.divf %cst_157, %391 : f32
    %393 = vector.broadcast %392 : f32 to vector<1x128xf32>
    %394 = arith.mulf %388, %393 : vector<1x128xf32>
    %c4 = arith.constant 4 : index
    %c0_158 = arith.constant 0 : index
    %395 = vector.load %arg4[%c4, %c0_158] : memref<8x128xf32, #tpu.memory_space<vmem>>, vector<1x128xf32>
    tpu.vector_store %arg4[%c4, %c0_158], %394 {strides = array<i32>} : memref<8x128xf32, #tpu.memory_space<vmem>>, vector<1x128xf32>,
    %c5_i32_159 = arith.constant 5 : i32
    %396 = arith.addi %0, %c5_i32_159 : i32
    %cst_160 = arith.constant 0.000000e+00 : f32
    %397 = vector.broadcast %cst_160 : f32 to vector<1x128xf32>
    %c10_i32_161 = arith.constant 10 : i32
    %398 = arith.muli %396, %c10_i32_161 : i32
    %c0_i32_162 = arith.constant 0 : i32
    %399 = arith.addi %398, %c0_i32_162 : i32
    %400 = arith.index_cast %399 : i32 to index
    %401 = memref.load %arg1[%400] : memref<160xi32, #tpu.memory_space<smem>>
    %402 = arith.index_cast %401 : i32 to index
    %c0_163 = arith.constant 0 : index
    %403 = vector.load %arg3[%402, %c0_163] : memref<72x128xf32, #tpu.memory_space<vmem>>, vector<1x128xf32>
    %404 = arith.addf %397, %403 : vector<1x128xf32>
    %c10_i32_164 = arith.constant 10 : i32
    %405 = arith.muli %396, %c10_i32_164 : i32
    %c1_i32_165 = arith.constant 1 : i32
    %406 = arith.addi %405, %c1_i32_165 : i32
    %407 = arith.index_cast %406 : i32 to index
    %408 = memref.load %arg1[%407] : memref<160xi32, #tpu.memory_space<smem>>
    %409 = arith.index_cast %408 : i32 to index
    %c0_166 = arith.constant 0 : index
    %410 = vector.load %arg3[%409, %c0_166] : memref<72x128xf32, #tpu.memory_space<vmem>>, vector<1x128xf32>
    %411 = arith.addf %404, %410 : vector<1x128xf32>
    %c10_i32_167 = arith.constant 10 : i32
    %412 = arith.muli %396, %c10_i32_167 : i32
    %c2_i32_168 = arith.constant 2 : i32
    %413 = arith.addi %412, %c2_i32_168 : i32
    %414 = arith.index_cast %413 : i32 to index
    %415 = memref.load %arg1[%414] : memref<160xi32, #tpu.memory_space<smem>>
    %416 = arith.index_cast %415 : i32 to index
    %c0_169 = arith.constant 0 : index
    %417 = vector.load %arg3[%416, %c0_169] : memref<72x128xf32, #tpu.memory_space<vmem>>, vector<1x128xf32>
    %418 = arith.addf %411, %417 : vector<1x128xf32>
    %c10_i32_170 = arith.constant 10 : i32
    %419 = arith.muli %396, %c10_i32_170 : i32
    %c3_i32_171 = arith.constant 3 : i32
    %420 = arith.addi %419, %c3_i32_171 : i32
    %421 = arith.index_cast %420 : i32 to index
    %422 = memref.load %arg1[%421] : memref<160xi32, #tpu.memory_space<smem>>
    %423 = arith.index_cast %422 : i32 to index
    %c0_172 = arith.constant 0 : index
    %424 = vector.load %arg3[%423, %c0_172] : memref<72x128xf32, #tpu.memory_space<vmem>>, vector<1x128xf32>
    %425 = arith.addf %418, %424 : vector<1x128xf32>
    %c10_i32_173 = arith.constant 10 : i32
    %426 = arith.muli %396, %c10_i32_173 : i32
    %c4_i32_174 = arith.constant 4 : i32
    %427 = arith.addi %426, %c4_i32_174 : i32
    %428 = arith.index_cast %427 : i32 to index
    %429 = memref.load %arg1[%428] : memref<160xi32, #tpu.memory_space<smem>>
    %430 = arith.index_cast %429 : i32 to index
    %c0_175 = arith.constant 0 : index
    %431 = vector.load %arg3[%430, %c0_175] : memref<72x128xf32, #tpu.memory_space<vmem>>, vector<1x128xf32>
    %432 = arith.addf %425, %431 : vector<1x128xf32>
    %c10_i32_176 = arith.constant 10 : i32
    %433 = arith.muli %396, %c10_i32_176 : i32
    %c5_i32_177 = arith.constant 5 : i32
    %434 = arith.addi %433, %c5_i32_177 : i32
    %435 = arith.index_cast %434 : i32 to index
    %436 = memref.load %arg1[%435] : memref<160xi32, #tpu.memory_space<smem>>
    %437 = arith.index_cast %436 : i32 to index
    %c0_178 = arith.constant 0 : index
    %438 = vector.load %arg3[%437, %c0_178] : memref<72x128xf32, #tpu.memory_space<vmem>>, vector<1x128xf32>
    %439 = arith.addf %432, %438 : vector<1x128xf32>
    %c10_i32_179 = arith.constant 10 : i32
    %440 = arith.muli %396, %c10_i32_179 : i32
    %c6_i32_180 = arith.constant 6 : i32
    %441 = arith.addi %440, %c6_i32_180 : i32
    %442 = arith.index_cast %441 : i32 to index
    %443 = memref.load %arg1[%442] : memref<160xi32, #tpu.memory_space<smem>>
    %444 = arith.index_cast %443 : i32 to index
    %c0_181 = arith.constant 0 : index
    %445 = vector.load %arg3[%444, %c0_181] : memref<72x128xf32, #tpu.memory_space<vmem>>, vector<1x128xf32>
    %446 = arith.addf %439, %445 : vector<1x128xf32>
    %c10_i32_182 = arith.constant 10 : i32
    %447 = arith.muli %396, %c10_i32_182 : i32
    %c7_i32_183 = arith.constant 7 : i32
    %448 = arith.addi %447, %c7_i32_183 : i32
    %449 = arith.index_cast %448 : i32 to index
    %450 = memref.load %arg1[%449] : memref<160xi32, #tpu.memory_space<smem>>
    %451 = arith.index_cast %450 : i32 to index
    %c0_184 = arith.constant 0 : index
    %452 = vector.load %arg3[%451, %c0_184] : memref<72x128xf32, #tpu.memory_space<vmem>>, vector<1x128xf32>
    %453 = arith.addf %446, %452 : vector<1x128xf32>
    %c10_i32_185 = arith.constant 10 : i32
    %454 = arith.muli %396, %c10_i32_185 : i32
    %c8_i32_186 = arith.constant 8 : i32
    %455 = arith.addi %454, %c8_i32_186 : i32
    %456 = arith.index_cast %455 : i32 to index
    %457 = memref.load %arg1[%456] : memref<160xi32, #tpu.memory_space<smem>>
    %458 = arith.index_cast %457 : i32 to index
    %c0_187 = arith.constant 0 : index
    %459 = vector.load %arg3[%458, %c0_187] : memref<72x128xf32, #tpu.memory_space<vmem>>, vector<1x128xf32>
    %460 = arith.addf %453, %459 : vector<1x128xf32>
    %c10_i32_188 = arith.constant 10 : i32
    %461 = arith.muli %396, %c10_i32_188 : i32
    %c9_i32_189 = arith.constant 9 : i32
    %462 = arith.addi %461, %c9_i32_189 : i32
    %463 = arith.index_cast %462 : i32 to index
    %464 = memref.load %arg1[%463] : memref<160xi32, #tpu.memory_space<smem>>
    %465 = arith.index_cast %464 : i32 to index
    %c0_190 = arith.constant 0 : index
    %466 = vector.load %arg3[%465, %c0_190] : memref<72x128xf32, #tpu.memory_space<vmem>>, vector<1x128xf32>
    %467 = arith.addf %460, %466 : vector<1x128xf32>
    %468 = arith.index_cast %396 : i32 to index
    %469 = memref.load %arg2[%468] : memref<16xi32, #tpu.memory_space<smem>>
    %470 = arith.sitofp %469 : i32 to f32
    %cst_191 = arith.constant 1.000000e+00 : f32
    %471 = arith.divf %cst_191, %470 : f32
    %472 = vector.broadcast %471 : f32 to vector<1x128xf32>
    %473 = arith.mulf %467, %472 : vector<1x128xf32>
    %c5 = arith.constant 5 : index
    %c0_192 = arith.constant 0 : index
    %474 = vector.load %arg4[%c5, %c0_192] : memref<8x128xf32, #tpu.memory_space<vmem>>, vector<1x128xf32>
    tpu.vector_store %arg4[%c5, %c0_192], %473 {strides = array<i32>} : memref<8x128xf32, #tpu.memory_space<vmem>>, vector<1x128xf32>,
    %c6_i32_193 = arith.constant 6 : i32
    %475 = arith.addi %0, %c6_i32_193 : i32
    %cst_194 = arith.constant 0.000000e+00 : f32
    %476 = vector.broadcast %cst_194 : f32 to vector<1x128xf32>
    %c10_i32_195 = arith.constant 10 : i32
    %477 = arith.muli %475, %c10_i32_195 : i32
    %c0_i32_196 = arith.constant 0 : i32
    %478 = arith.addi %477, %c0_i32_196 : i32
    %479 = arith.index_cast %478 : i32 to index
    %480 = memref.load %arg1[%479] : memref<160xi32, #tpu.memory_space<smem>>
    %481 = arith.index_cast %480 : i32 to index
    %c0_197 = arith.constant 0 : index
    %482 = vector.load %arg3[%481, %c0_197] : memref<72x128xf32, #tpu.memory_space<vmem>>, vector<1x128xf32>
    %483 = arith.addf %476, %482 : vector<1x128xf32>
    %c10_i32_198 = arith.constant 10 : i32
    %484 = arith.muli %475, %c10_i32_198 : i32
    %c1_i32_199 = arith.constant 1 : i32
    %485 = arith.addi %484, %c1_i32_199 : i32
    %486 = arith.index_cast %485 : i32 to index
    %487 = memref.load %arg1[%486] : memref<160xi32, #tpu.memory_space<smem>>
    %488 = arith.index_cast %487 : i32 to index
    %c0_200 = arith.constant 0 : index
    %489 = vector.load %arg3[%488, %c0_200] : memref<72x128xf32, #tpu.memory_space<vmem>>, vector<1x128xf32>
    %490 = arith.addf %483, %489 : vector<1x128xf32>
    %c10_i32_201 = arith.constant 10 : i32
    %491 = arith.muli %475, %c10_i32_201 : i32
    %c2_i32_202 = arith.constant 2 : i32
    %492 = arith.addi %491, %c2_i32_202 : i32
    %493 = arith.index_cast %492 : i32 to index
    %494 = memref.load %arg1[%493] : memref<160xi32, #tpu.memory_space<smem>>
    %495 = arith.index_cast %494 : i32 to index
    %c0_203 = arith.constant 0 : index
    %496 = vector.load %arg3[%495, %c0_203] : memref<72x128xf32, #tpu.memory_space<vmem>>, vector<1x128xf32>
    %497 = arith.addf %490, %496 : vector<1x128xf32>
    %c10_i32_204 = arith.constant 10 : i32
    %498 = arith.muli %475, %c10_i32_204 : i32
    %c3_i32_205 = arith.constant 3 : i32
    %499 = arith.addi %498, %c3_i32_205 : i32
    %500 = arith.index_cast %499 : i32 to index
    %501 = memref.load %arg1[%500] : memref<160xi32, #tpu.memory_space<smem>>
    %502 = arith.index_cast %501 : i32 to index
    %c0_206 = arith.constant 0 : index
    %503 = vector.load %arg3[%502, %c0_206] : memref<72x128xf32, #tpu.memory_space<vmem>>, vector<1x128xf32>
    %504 = arith.addf %497, %503 : vector<1x128xf32>
    %c10_i32_207 = arith.constant 10 : i32
    %505 = arith.muli %475, %c10_i32_207 : i32
    %c4_i32_208 = arith.constant 4 : i32
    %506 = arith.addi %505, %c4_i32_208 : i32
    %507 = arith.index_cast %506 : i32 to index
    %508 = memref.load %arg1[%507] : memref<160xi32, #tpu.memory_space<smem>>
    %509 = arith.index_cast %508 : i32 to index
    %c0_209 = arith.constant 0 : index
    %510 = vector.load %arg3[%509, %c0_209] : memref<72x128xf32, #tpu.memory_space<vmem>>, vector<1x128xf32>
    %511 = arith.addf %504, %510 : vector<1x128xf32>
    %c10_i32_210 = arith.constant 10 : i32
    %512 = arith.muli %475, %c10_i32_210 : i32
    %c5_i32_211 = arith.constant 5 : i32
    %513 = arith.addi %512, %c5_i32_211 : i32
    %514 = arith.index_cast %513 : i32 to index
    %515 = memref.load %arg1[%514] : memref<160xi32, #tpu.memory_space<smem>>
    %516 = arith.index_cast %515 : i32 to index
    %c0_212 = arith.constant 0 : index
    %517 = vector.load %arg3[%516, %c0_212] : memref<72x128xf32, #tpu.memory_space<vmem>>, vector<1x128xf32>
    %518 = arith.addf %511, %517 : vector<1x128xf32>
    %c10_i32_213 = arith.constant 10 : i32
    %519 = arith.muli %475, %c10_i32_213 : i32
    %c6_i32_214 = arith.constant 6 : i32
    %520 = arith.addi %519, %c6_i32_214 : i32
    %521 = arith.index_cast %520 : i32 to index
    %522 = memref.load %arg1[%521] : memref<160xi32, #tpu.memory_space<smem>>
    %523 = arith.index_cast %522 : i32 to index
    %c0_215 = arith.constant 0 : index
    %524 = vector.load %arg3[%523, %c0_215] : memref<72x128xf32, #tpu.memory_space<vmem>>, vector<1x128xf32>
    %525 = arith.addf %518, %524 : vector<1x128xf32>
    %c10_i32_216 = arith.constant 10 : i32
    %526 = arith.muli %475, %c10_i32_216 : i32
    %c7_i32_217 = arith.constant 7 : i32
    %527 = arith.addi %526, %c7_i32_217 : i32
    %528 = arith.index_cast %527 : i32 to index
    %529 = memref.load %arg1[%528] : memref<160xi32, #tpu.memory_space<smem>>
    %530 = arith.index_cast %529 : i32 to index
    %c0_218 = arith.constant 0 : index
    %531 = vector.load %arg3[%530, %c0_218] : memref<72x128xf32, #tpu.memory_space<vmem>>, vector<1x128xf32>
    %532 = arith.addf %525, %531 : vector<1x128xf32>
    %c10_i32_219 = arith.constant 10 : i32
    %533 = arith.muli %475, %c10_i32_219 : i32
    %c8_i32_220 = arith.constant 8 : i32
    %534 = arith.addi %533, %c8_i32_220 : i32
    %535 = arith.index_cast %534 : i32 to index
    %536 = memref.load %arg1[%535] : memref<160xi32, #tpu.memory_space<smem>>
    %537 = arith.index_cast %536 : i32 to index
    %c0_221 = arith.constant 0 : index
    %538 = vector.load %arg3[%537, %c0_221] : memref<72x128xf32, #tpu.memory_space<vmem>>, vector<1x128xf32>
    %539 = arith.addf %532, %538 : vector<1x128xf32>
    %c10_i32_222 = arith.constant 10 : i32
    %540 = arith.muli %475, %c10_i32_222 : i32
    %c9_i32_223 = arith.constant 9 : i32
    %541 = arith.addi %540, %c9_i32_223 : i32
    %542 = arith.index_cast %541 : i32 to index
    %543 = memref.load %arg1[%542] : memref<160xi32, #tpu.memory_space<smem>>
    %544 = arith.index_cast %543 : i32 to index
    %c0_224 = arith.constant 0 : index
    %545 = vector.load %arg3[%544, %c0_224] : memref<72x128xf32, #tpu.memory_space<vmem>>, vector<1x128xf32>
    %546 = arith.addf %539, %545 : vector<1x128xf32>
    %547 = arith.index_cast %475 : i32 to index
    %548 = memref.load %arg2[%547] : memref<16xi32, #tpu.memory_space<smem>>
    %549 = arith.sitofp %548 : i32 to f32
    %cst_225 = arith.constant 1.000000e+00 : f32
    %550 = arith.divf %cst_225, %549 : f32
    %551 = vector.broadcast %550 : f32 to vector<1x128xf32>
    %552 = arith.mulf %546, %551 : vector<1x128xf32>
    %c6 = arith.constant 6 : index
    %c0_226 = arith.constant 0 : index
    %553 = vector.load %arg4[%c6, %c0_226] : memref<8x128xf32, #tpu.memory_space<vmem>>, vector<1x128xf32>
    tpu.vector_store %arg4[%c6, %c0_226], %552 {strides = array<i32>} : memref<8x128xf32, #tpu.memory_space<vmem>>, vector<1x128xf32>,
    %c7_i32_227 = arith.constant 7 : i32
    %554 = arith.addi %0, %c7_i32_227 : i32
    %cst_228 = arith.constant 0.000000e+00 : f32
    %555 = vector.broadcast %cst_228 : f32 to vector<1x128xf32>
    %c10_i32_229 = arith.constant 10 : i32
    %556 = arith.muli %554, %c10_i32_229 : i32
    %c0_i32_230 = arith.constant 0 : i32
    %557 = arith.addi %556, %c0_i32_230 : i32
    %558 = arith.index_cast %557 : i32 to index
    %559 = memref.load %arg1[%558] : memref<160xi32, #tpu.memory_space<smem>>
    %560 = arith.index_cast %559 : i32 to index
    %c0_231 = arith.constant 0 : index
    %561 = vector.load %arg3[%560, %c0_231] : memref<72x128xf32, #tpu.memory_space<vmem>>, vector<1x128xf32>
    %562 = arith.addf %555, %561 : vector<1x128xf32>
    %c10_i32_232 = arith.constant 10 : i32
    %563 = arith.muli %554, %c10_i32_232 : i32
    %c1_i32_233 = arith.constant 1 : i32
    %564 = arith.addi %563, %c1_i32_233 : i32
    %565 = arith.index_cast %564 : i32 to index
    %566 = memref.load %arg1[%565] : memref<160xi32, #tpu.memory_space<smem>>
    %567 = arith.index_cast %566 : i32 to index
    %c0_234 = arith.constant 0 : index
    %568 = vector.load %arg3[%567, %c0_234] : memref<72x128xf32, #tpu.memory_space<vmem>>, vector<1x128xf32>
    %569 = arith.addf %562, %568 : vector<1x128xf32>
    %c10_i32_235 = arith.constant 10 : i32
    %570 = arith.muli %554, %c10_i32_235 : i32
    %c2_i32_236 = arith.constant 2 : i32
    %571 = arith.addi %570, %c2_i32_236 : i32
    %572 = arith.index_cast %571 : i32 to index
    %573 = memref.load %arg1[%572] : memref<160xi32, #tpu.memory_space<smem>>
    %574 = arith.index_cast %573 : i32 to index
    %c0_237 = arith.constant 0 : index
    %575 = vector.load %arg3[%574, %c0_237] : memref<72x128xf32, #tpu.memory_space<vmem>>, vector<1x128xf32>
    %576 = arith.addf %569, %575 : vector<1x128xf32>
    %c10_i32_238 = arith.constant 10 : i32
    %577 = arith.muli %554, %c10_i32_238 : i32
    %c3_i32_239 = arith.constant 3 : i32
    %578 = arith.addi %577, %c3_i32_239 : i32
    %579 = arith.index_cast %578 : i32 to index
    %580 = memref.load %arg1[%579] : memref<160xi32, #tpu.memory_space<smem>>
    %581 = arith.index_cast %580 : i32 to index
    %c0_240 = arith.constant 0 : index
    %582 = vector.load %arg3[%581, %c0_240] : memref<72x128xf32, #tpu.memory_space<vmem>>, vector<1x128xf32>
    %583 = arith.addf %576, %582 : vector<1x128xf32>
    %c10_i32_241 = arith.constant 10 : i32
    %584 = arith.muli %554, %c10_i32_241 : i32
    %c4_i32_242 = arith.constant 4 : i32
    %585 = arith.addi %584, %c4_i32_242 : i32
    %586 = arith.index_cast %585 : i32 to index
    %587 = memref.load %arg1[%586] : memref<160xi32, #tpu.memory_space<smem>>
    %588 = arith.index_cast %587 : i32 to index
    %c0_243 = arith.constant 0 : index
    %589 = vector.load %arg3[%588, %c0_243] : memref<72x128xf32, #tpu.memory_space<vmem>>, vector<1x128xf32>
    %590 = arith.addf %583, %589 : vector<1x128xf32>
    %c10_i32_244 = arith.constant 10 : i32
    %591 = arith.muli %554, %c10_i32_244 : i32
    %c5_i32_245 = arith.constant 5 : i32
    %592 = arith.addi %591, %c5_i32_245 : i32
    %593 = arith.index_cast %592 : i32 to index
    %594 = memref.load %arg1[%593] : memref<160xi32, #tpu.memory_space<smem>>
    %595 = arith.index_cast %594 : i32 to index
    %c0_246 = arith.constant 0 : index
    %596 = vector.load %arg3[%595, %c0_246] : memref<72x128xf32, #tpu.memory_space<vmem>>, vector<1x128xf32>
    %597 = arith.addf %590, %596 : vector<1x128xf32>
    %c10_i32_247 = arith.constant 10 : i32
    %598 = arith.muli %554, %c10_i32_247 : i32
    %c6_i32_248 = arith.constant 6 : i32
    %599 = arith.addi %598, %c6_i32_248 : i32
    %600 = arith.index_cast %599 : i32 to index
    %601 = memref.load %arg1[%600] : memref<160xi32, #tpu.memory_space<smem>>
    %602 = arith.index_cast %601 : i32 to index
    %c0_249 = arith.constant 0 : index
    %603 = vector.load %arg3[%602, %c0_249] : memref<72x128xf32, #tpu.memory_space<vmem>>, vector<1x128xf32>
    %604 = arith.addf %597, %603 : vector<1x128xf32>
    %c10_i32_250 = arith.constant 10 : i32
    %605 = arith.muli %554, %c10_i32_250 : i32
    %c7_i32_251 = arith.constant 7 : i32
    %606 = arith.addi %605, %c7_i32_251 : i32
    %607 = arith.index_cast %606 : i32 to index
    %608 = memref.load %arg1[%607] : memref<160xi32, #tpu.memory_space<smem>>
    %609 = arith.index_cast %608 : i32 to index
    %c0_252 = arith.constant 0 : index
    %610 = vector.load %arg3[%609, %c0_252] : memref<72x128xf32, #tpu.memory_space<vmem>>, vector<1x128xf32>
    %611 = arith.addf %604, %610 : vector<1x128xf32>
    %c10_i32_253 = arith.constant 10 : i32
    %612 = arith.muli %554, %c10_i32_253 : i32
    %c8_i32_254 = arith.constant 8 : i32
    %613 = arith.addi %612, %c8_i32_254 : i32
    %614 = arith.index_cast %613 : i32 to index
    %615 = memref.load %arg1[%614] : memref<160xi32, #tpu.memory_space<smem>>
    %616 = arith.index_cast %615 : i32 to index
    %c0_255 = arith.constant 0 : index
    %617 = vector.load %arg3[%616, %c0_255] : memref<72x128xf32, #tpu.memory_space<vmem>>, vector<1x128xf32>
    %618 = arith.addf %611, %617 : vector<1x128xf32>
    %c10_i32_256 = arith.constant 10 : i32
    %619 = arith.muli %554, %c10_i32_256 : i32
    %c9_i32_257 = arith.constant 9 : i32
    %620 = arith.addi %619, %c9_i32_257 : i32
    %621 = arith.index_cast %620 : i32 to index
    %622 = memref.load %arg1[%621] : memref<160xi32, #tpu.memory_space<smem>>
    %623 = arith.index_cast %622 : i32 to index
    %c0_258 = arith.constant 0 : index
    %624 = vector.load %arg3[%623, %c0_258] : memref<72x128xf32, #tpu.memory_space<vmem>>, vector<1x128xf32>
    %625 = arith.addf %618, %624 : vector<1x128xf32>
    %626 = arith.index_cast %554 : i32 to index
    %627 = memref.load %arg2[%626] : memref<16xi32, #tpu.memory_space<smem>>
    %628 = arith.sitofp %627 : i32 to f32
    %cst_259 = arith.constant 1.000000e+00 : f32
    %629 = arith.divf %cst_259, %628 : f32
    %630 = vector.broadcast %629 : f32 to vector<1x128xf32>
    %631 = arith.mulf %625, %630 : vector<1x128xf32>
    %c7 = arith.constant 7 : index
    %c0_260 = arith.constant 0 : index
    %632 = vector.load %arg4[%c7, %c0_260] : memref<8x128xf32, #tpu.memory_space<vmem>>, vector<1x128xf32>
    tpu.vector_store %arg4[%c7, %c0_260], %631 {strides = array<i32>} : memref<8x128xf32, #tpu.memory_space<vmem>>, vector<1x128xf32>,
    return
  }
  func.func @transform_0(%arg0: i32, %arg1: memref<160xi32, #tpu.memory_space<smem>>, %arg2: memref<16xi32, #tpu.memory_space<smem>>) -> (i32, i32) {
    %c0_i32 = arith.constant 0 : i32
    %c0_i32_0 = arith.constant 0 : i32
    %c0_i32_1 = arith.constant 0 : i32
    return %c0_i32, %c0_i32_0 : i32, i32
  }
  func.func @transform_1(%arg0: i32, %arg1: memref<160xi32, #tpu.memory_space<smem>>, %arg2: memref<16xi32, #tpu.memory_space<smem>>) -> (i32, i32) {
    %c0_i32 = arith.constant 0 : i32
    %c0_i32_0 = arith.constant 0 : i32
    return %arg0, %c0_i32 : i32, i32
  }
}

</mosaic_0001>

<bundles_post_ra>
// kernel: tpu_custom_call.1
= control target key start
LH: loop header
LB: loop body
LE: loop exit
PB: predicated region body
PF: predicated region fallthrough
CT: control target
= control target key end

     0   :  { %s1360_s0 = inlined_call_operand.hbm [shape: s32[160], index: 0, kind: input, shape index: {}]   ;;  %s1361_s2 = inlined_call_operand.hbm [shape: f32[72,128], index: 2, kind: input, shape index: {}]   ;;  %s1362_s3 = inlined_call_operand.hbm [shape: f32[16,128], index: 3, kind: output, shape index: {}]   ;;  %s1363_s1 = inlined_call_operand.vmem [shape: s32[16], index: 1, kind: input, shape index: {}]  }
   0x1   :  { %1379 = sst [smem:[#allocation22_spill]] %s1361_s2  ;;  %s842_s14 = scalar_lea.hbm %s1360_s0, 32 }
   0x2   :  { %1380 = sst [smem:[#allocation23_spill]] %s1362_s3  ;;  %p843_p0 = scmp.ne.s32.totalorder %s1360_s0, %s842_s14 }
   0x3   :  { %p846_p1 = scmp.lt.u32.totalorder %s842_s14, %s1360_s0 }
   0x5   :  { %p848_p2 = pnand %p846_p1, %p843_p0 }
   0x7   :  { %851 = shalt.err (!%p848_p2)  }
   0x8   :  { %s962_s19 = smov [#allocation3]   ;;  %s10_s24 = sshll.u32 %s1363_s1, 4  ;;  %s11_s24 = int_to_ptr.vmem [resolvable:$true] %s10_s24 }
   0x9   :  { %9 = dma.hbm_to_smem %s1360_s0, 32, %s962_s19, [#allocation2] }
   0xa   :  { %s852_s25 = scalar_lea.vmem %s11_s24, 16  ;;  %p857_p4 = scmp.lt.s32.totalorder %s11_s24, %s11_s24 }
   0xb   :  { %p853_p3 = scmp.ne.s32.totalorder %s11_s24, %s852_s25  ;;  %p858_p5 = scmp.lt.s32.totalorder %s852_s25, %s852_s25 }
   0xd   :  { %p859_p6 = por %p858_p5, %p857_p4 }
   0xf   :  { %p860_p7 = pnand %p859_p6, %p853_p3 }
  0x11   :  { %863 = shalt.err (!%p860_p7)  }
  0x12   :  { %s963_s26 = smov [#allocation4]  }
  0x13   :  { %13 = dma.vmem_to_smem %s11_s24, 16, %s963_s26, [#allocation2] }
  0x14   :  { %936 = dma.done.wait [#allocation2], 48 }
  0x15   :  { %937 = vsyncadd [#allocation2], 4294967248 }
  0x16   :  { %15 = sfence }
  0x17   :  { %16 = vsyncpa [#allocation6], 0 }
  0x18   :  { %17 = vsyncpa [#allocation7], 0 }
  0x19   :  { %19 = vsyncpa [#allocation7 + $0x1], 0  ;;  %s1003_s0 = smov 0   ;;  %s1005_s27 = smov 0  }
  0x1a   :  { %s1007_s1 = smov 0   ;;  %s1009_s28 = smov 0  }
  0x1b LB: > { %1381 = sst [smem:[#allocation12_spill]] %s948_s0  ;;  %s1024_s29 = sadd.s32 4294967295, %s960_s28   ;;  %s960_s28 = sphi %s1009_s28, %s1412_s28   ;;  %s956_s1 = sphi %s1007_s1, %s1415_s1   ;;  %s952_s27 = sphi %s1005_s27, %s1414_s27   ;;  %s948_s0 = sphi %s1003_s0, %s1413_s0  }
  0x1c   : > { %1382 = sst [smem:[#allocation13_spill]] %s952_s27  ;;  %s745_s30 = sadd.s32 4294967294, %s960_s28  }
  0x1d   : > { %1383 = sst [smem:[#allocation14_spill]] %s956_s1  ;;  %s1028_s4 = sadd.s32 1, %s960_s28  }
  0x1e   : > { %1384 = sst [smem:[#allocation15_spill]] %s960_s28  ;;  %s53_s5 = sadd.s32 1, %s956_s1 }
  0x1f   : > { %1385 = sst [smem:[#allocation16_spill]] %s1024_s29  ;;  %s50_s6 = ssub.s32 %s960_s28, %s1028_s4 }
  0x20   : > { %1386 = sst [smem:[#allocation17_spill]] %s1028_s4  ;;  %p63_p8 = scmp.ne.s32.totalorder %s956_s1, %s952_s27 }
  0x21   : > { %p51_p9 = scmp.eq.s32.totalorder %s50_s6, 0  ;;  %p64_p10 = scmp.eq.s32.totalorder %s1024_s29, 1 }
  0x22   : > { %p69_p11 = scmp.ne.s32.totalorder %s952_s27, %s948_s0  ;;  %p70_p12 = scmp.eq.s32.totalorder %s745_s30, 1 }
  0x23   : > { %s1039_s7 = scalar_select %p51_p9, %s956_s1, %s53_s5  }
  0x24   : > { %p1041_p13 = por %p64_p10, %p63_p8  ;;  %p1045_p0 = por %p70_p12, %p69_p11 }
  0x25   : > { %1387 = sst [smem:[#allocation18_spill]] %s1039_s7  ;;  %p746_p1 = scmp.ge.s32.totalorder %s960_s28, 1 }
  0x26   : > { %s1388_s8 = scalar_select %p1041_p13, 1, 0 }
  0x27   : > { %s1390_s9 = scalar_select %p1045_p0, 1, 0 }
  0x28   : > { %1389 = sst [smem:[#allocation19_spill]] %s1388_s8  ;;  %p77_p2 = scmp.lt.s32.totalorder %s960_s28, 3 }
  0x29   : > { %1391 = sst [smem:[#allocation20_spill]] %s1390_s9  ;;  %p1364_p3 = scmp.eq.s32.totalorder %s1024_s29, 0 }
  0x2a   : > { %p1052_p4 = pnand %p746_p1, %p77_p2  ;;  %s964_s11 = smov [#allocation5]  }
  0x2b   : > { %s89_s12 = sshll.u32 %s964_s11, 4  ;;  %s1394_s2 = sld [smem:[#allocation22_spill]]  ;;  %s90_s12 = int_to_ptr.vmem [resolvable:$true] %s89_s12 }
  0x2c   : > { %s1392_s10 = scalar_select %p1052_p4, 1, 0 }
  0x2d   : > { %p778_p5 = pneg %p1052_p4 }
  0x2f   : > { %p1060_p6 = pnand %p1364_p3, %p778_p5 }
  0x31   : > { %s864_s16 = scalar_lea.hbm %s1394_s2, 1152  ;;  %p866_p8 = pneg %p1060_p6 }
  0x32   : > { %p865_p7 = scmp.ne.s32.totalorder %s1394_s2, %s864_s16  ;;  %p871_p11 = scmp.lt.u32.totalorder %s864_s16, %s1394_s2 }
  0x34   : > { %p867_p9 = pnand %p866_p8, %p865_p7 }
  0x36   : > { %p868_p10 = pneg %p867_p9 }
  0x38   : > { %p873_p12 = pnand %p871_p11, %p868_p10 }
  0x3a   : > { %876 = shalt.err (!%p873_p12)
}
  0x3b   : > { %s877_s21 = scalar_lea.vmem %s90_s12, 1152  ;;  %p885_p3 = scmp.lt.s32.totalorder %s90_s12, %s90_s12 }
  0x3c   : > { %p878_p1 = scmp.ne.s32.totalorder %s90_s12, %s877_s21  ;;  %p886_p0 = scmp.lt.s32.totalorder %s877_s21, %s877_s21 }
  0x3e   : > { %p880_p2 = pnand %p878_p1, %p866_p8  ;;  %p887_p13 = por %p886_p0, %p885_p3 }
  0x40   : > { %p881_p5 = pneg %p880_p2 }
  0x42   : > { %p888_p4 = pnand %p887_p13, %p881_p5 }
  0x44   : > { %891 = shalt.err (!%p888_p4)
}
  0x45   : > { %s965_s22 = smov 128   ;;  %s966_s23 = smov 8  }
  0x46   : > { %781 = dma.hbm_to_vmem [thread:$0]  (!%p1060_p6), %s1394_s2, 1152, %s90_s12, [#allocation6], %s965_s22, %s965_s22, %s966_s23  }
  0x47   : > { %p1395_p7 = scmp.ne.s32.totalorder %s1392_s10, 0 }
  0x49   : > { %105 = sbr.rel (%p1395_p7) target bundleno = 250 (0xfa), region = 24 }
  0x50   : > { %p1396_p9 = scmp.eq.s32.totalorder %s1024_s29, 0 }
  0x52   : > { %939 = dma.done.wait (%p1396_p9), [#allocation6], 1152   ;;  %p1397_p8 = pmov %p1396_p9 }
  0x53   : > { %s1087_s26 = sshll.u32 %s1024_s29, 3 }
  0x54   : > { %941 = vsyncadd (%p1397_p8), [#allocation6], 4294966144  ;;  %s171_s30 = sld [smem:[#allocation4 + %s1087_s26]]  ;;  %s179_s5 = sadd.s32 1, %s1087_s26 }
  0x55   : > { %s230_s6 = sld [smem:[#allocation4 + %s179_s5]]  ;;  %s238_s11 = sadd.s32 2, %s1087_s26 }
  0x56   : > { %s297_s12 = sadd.s32 3, %s1087_s26  ;;  %s1094_s13 = smul.u32 10, %s179_s5 }
  0x57   : > { %s289_s14 = sld [smem:[#allocation4 + %s238_s11]]  ;;  %s1096_s15 = smul.u32 10, %s238_s11 }
  0x58   : > { %s348_s16 = sld [smem:[#allocation4 + %s297_s12]]  ;;  %s356_s17 = sadd.s32 4, %s1087_s26 }
  0x59   : > { %s415_s18 = sadd.s32 5, %s1087_s26  ;;  %s1100_s20 = smul.u32 10, %s297_s12 }
  0x5a   : > { %s172_s19 = scvt.s32.f32 %s171_s30  ;;  %s407_s22 = sld [smem:[#allocation4 + %s356_s17]] }
  0x5b   : > { %s231_s21 = scvt.s32.f32 %s230_s6  ;;  %s1102_s23 = smul.u32 10, %s356_s17 }
  0x5c   : > { %v173_v0 = vstv %s172_s19  ;;  %s466_s24 = sld [smem:[#allocation4 + %s415_s18]]  ;;  %s474_s5 = sadd.s32 6, %s1087_s26 }
  0x5d   : > { %826 = vrcp.f32 %v173_v0  ;;  %v232_v1 = vstv %s231_s21  ;;  %s290_s25 = scvt.s32.f32 %s289_s14  ;;  %s1105_s10 = smul.u32 10, %s415_s18 }
  0x5e   : > { %828 = vrcp.f32 %v232_v1  ;;  %s349_s11 = scvt.s32.f32 %s348_s16  ;;  %s525_s30 = sld [smem:[#allocation4 + %s474_s5]] }
  0x5f   : > { %v291_v2 = vstv %s290_s25  ;;  %s533_s6 = sadd.s32 7, %s1087_s26  ;;  %s1108_s12 = smul.u32 10, %s474_s5 }
  0x60   : > { %830 = vrcp.f32 %v291_v2  ;;  %v350_v3 = vstv %s349_s11  ;;  %s584_s17 = sld [smem:[#allocation4 + %s533_s6]]  ;;  %s408_s19 = scvt.s32.f32 %s407_s22 }
  0x61   : > { %832 = vrcp.f32 %v350_v3  ;;  %s1398_s21 = sand.u32 1, %s952_s27   ;;  %s1114_s7 = smul.u32 10, %s533_s6 }
  0x62   : > { %s1112_s14 = sshll.u32 %s1398_s21, 3  ;;  %s467_s2 = scvt.s32.f32 %s466_s24  ;;  %v409_v4 = vstv %s408_s19 }
  0x63   : > { %1399 = sst [smem:[#allocation21_spill]] %s1114_s7  ;;  %s1117_s16 = smul.u32 80, %s1024_s29  ;;  %834 = vrcp.f32 %v409_v4 }
  0x64   : > { %v468_v5 = vstv %s467_s2  ;;  %s1120_s26 = sld [smem:[#allocation3 + %s1094_s13]]  ;;  %s526_s22 = scvt.s32.f32 %s525_s30 }
  0x65   : > { %836 = vrcp.f32 %v468_v5  ;;  %s1124_s25 = sld [smem:[#allocation3 + %s1117_s16]]  ;;  %s126_s5 = sadd.s32 1, %s1117_s16 }
  0x66   : > { %s585_s24 = scvt.s32.f32 %s584_s17  ;;  %v527_v7 = vstv %s526_s22  ;;  %s1127_s11 = sld [smem:[#allocation3 + %s126_s5]] }
  0x67   : > { %v827_v6 = vpop.eup %826  ;;  %s131_s6 = sadd.s32 2, %s1117_s16  ;;  %838 = vrcp.f32 %v527_v7  ;;  %s136_s30 = sadd.s32 3, %s1117_s16 }
  0x68   : > { %v829_v8 = vpop.eup %828  ;;  %756 = vpush %v827_v6  ;;  %v586_v9 = vstv %s585_s24  ;;  %s1130_s2 = sld [smem:[#allocation3 + %s131_s6]]  ;;  %s141_s17 = sadd.s32 4, %s1117_s16 }
  0x69   : > { %758 = vpush %v829_v8  ;;  %840 = vrcp.f32 %v586_v9  ;;  %s1133_s19 = sld [smem:[#allocation3 + %s136_s30]]  ;;  %s146_s22 = sadd.s32 5, %s1117_s16 }
  0x6a   : > { %v831_v10 = vpop.eup %830  ;;  %s1136_s21 = sld [smem:[#allocation3 + %s141_s17]]  ;;  %s151_s24 = sadd.s32 6, %s1117_s16 }
  0x6b   : > { %v833_v11 = vpop.eup %832  ;;  %760 = vpush %v831_v10  ;;  %s1139_s5 = sld [smem:[#allocation3 + %s146_s22]]  ;;  %s156_s6 = sadd.s32 7, %s1117_s16 }
  0x6c   : > { %762 = vpush %v833_v11  ;;  %s1143_s18 = sld [smem:[#allocation3 + %s151_s24]]  ;;  %s161_s17 = sadd.s32 8, %s1117_s16 }
  0x6d   : > { %v835_v12 = vpop.eup %834  ;;  %s1145_s30 = sld [smem:[#allocation3 + %s156_s6]]  ;;  %s166_s22 = sadd.s32 9, %s1117_s16 }
  0x6e   : > { %764 = vpush %v835_v12  ;;  %s1148_s1 = sld [smem:[#allocation3 + %s161_s17]]  ;;  %s1400_s24 = sadd.s32 1, %s1094_s13 }
  0x6f   : > { %v837_v13 = vpop.eup %836  ;;  %s1151_s4 = sld [smem:[#allocation3 + %s166_s22]]  ;;  %s123_s9 = scalar_lea.vmem [#allocation5], %s1124_s25 }
  0x70   : > { %766 = vpush %v837_v13  ;;  %s186_s6 = sld [smem:[#allocation3 + %s1400_s24]]  ;;  %v124_v16 = vld [vmem:[%s123_s9] sm:$0x1]  ;;  %s128_s0 = scalar_lea.vmem [#allocation5], %s1127_s11 }
  0x71   : > { %v839_v14 = vpop.eup %838  ;;  %v129_v17 = vld [vmem:[%s128_s0] sm:$0x1]  ;;  %s190_s17 = sadd.s32 2, %s1094_s13  ;;  %s195_s28 = sadd.s32 3, %s1094_s13 }
  0x72   : > { %768 = vpush %v839_v14  ;;  %s191_s16 = sld [smem:[#allocation3 + %s190_s17]]  ;;  %v130_v18 = vadd.f32 %v129_v17, %v124_v16  ;;  %s200_s22 = sadd.s32 4, %s1094_s13 }
  0x73   : > { %v841_v15 = vpop.eup %840  ;;  %s196_s3 = sld [smem:[#allocation3 + %s195_s28]]  ;;  %s205_s8 = sadd.s32 5, %s1094_s13 }
  0x74   : > { %770 = vpush %v841_v15  ;;  %s133_s27 = scalar_lea.vmem [#allocation5], %s1130_s2  ;;  %s182_s29 = scalar_lea.vmem [#allocation5], %s1120_s26 }
  0x75   : > { %v134_v19 = vld [vmem:[%s133_s27] sm:$0x1]  ;;  %s201_s24 = sld [smem:[#allocation3 + %s200_s22]]  ;;  %s210_s0 = sadd.s32 6, %s1094_s13 }
  0x76   : > { %v183_v20 = vld [vmem:[%s182_s29] sm:$0x1]  ;;  %s1163_s7 = sld [smem:[#allocation3 + %s205_s8]]  ;;  %s187_s9 = scalar_lea.vmem [#allocation5], %s186_s6  ;;  %v135_v22 = vadd.f32 %v134_v19, %v130_v18 }
  0x77   : > { %v188_v21 = vld [vmem:[%s187_s9] sm:$0x1]  ;;  %s215_s25 = sadd.s32 7, %s1094_s13  ;;  %s1167_s28 = sld [smem:[#allocation3 + %s210_s0]] }
  0x78   : > { %v189_v23 = vadd.f32 %v188_v21, %v183_v20  ;;  %s138_s11 = scalar_lea.vmem [#allocation5], %s1133_s19  ;;  %s192_s27 = scalar_lea.vmem [#allocation5], %s191_s16 }
  0x79   : > { %v139_v24 = vld [vmem:[%s138_s11] sm:$0x1]  ;;  %s1170_s29 = sld [smem:[#allocation3 + %s215_s25]]  ;;  %s197_s8 = scalar_lea.vmem [#allocation5], %s196_s3 }
  0x7a   : > { %v193_v25 = vld [vmem:[%s192_s27] sm:$0x1]  ;;  %s220_s26 = sadd.s32 8, %s1094_s13  ;;  %s225_s2 = sadd.s32 9, %s1094_s13  ;;  %v140_v28 = vadd.f32 %v139_v24, %v135_v22 }
  0x7b   : > { %v194_v26 = vadd.f32 %v193_v25, %v189_v23  ;;  %v198_v27 = vld [vmem:[%s197_s8] sm:$0x1]  ;;  %s1174_s6 = sld [smem:[#allocation3 + %s220_s26]]  ;;  %s143_s19 = scalar_lea.vmem [#allocation5], %s1136_s21 }
  0x7c   : > { %s1176_s17 = sld [smem:[#allocation3 + %s225_s2]]  ;;  %v144_v29 = vld [vmem:[%s143_s19] sm:$0x1]  ;;  %s244_s22 = sadd.s32 1, %s1096_s15 }
  0x7d   : > { %v199_v30 = vadd.f32 %v198_v27, %v194_v26  ;;  %s240_s16 = sld [smem:[#allocation3 + %s1096_s15]]  ;;  %s202_s9 = scalar_lea.vmem [#allocation5], %s201_s24  ;;  %v145_v32 = vadd.f32 %v144_v29, %v140_v28 }
  0x7e   : > { %v203_v31 = vld [vmem:[%s202_s9] sm:$0x1]  ;;  %s245_s3 = sld [smem:[#allocation3 + %s244_s22]]  ;;  %s249_s0 = sadd.s32 2, %s1096_s15 }
  0x7f   : > { %s250_s13 = sld [smem:[#allocation3 + %s249_s0]]  ;;  %s254_s25 = sadd.s32 3, %s1096_s15  ;;  %v204_v34 = vadd.f32 %v203_v31, %v199_v30 }
  0x80   : > { %s148_s11 = scalar_lea.vmem [#allocation5], %s1139_s5  ;;  %s255_s21 = sld [smem:[#allocation3 + %s254_s25]] }
  0x81   : > { %v149_v33 = vld [vmem:[%s148_s11] sm:$0x1]  ;;  %s207_s27 = scalar_lea.vmem [#allocation5], %s1163_s7  ;;  %s259_s8 = sadd.s32 4, %s1096_s15 }
  0x82   : > { %v208_v35 = vld [vmem:[%s207_s27] sm:$0x1]  ;;  %s1186_s26 = sld [smem:[#allocation3 + %s259_s8]]  ;;  %v150_v36 = vadd.f32 %v149_v33, %v145_v32  ;;  %s264_s2 = sadd.s32 5, %s1096_s15 }
  0x83   : > { %s241_s24 = scalar_lea.vmem [#allocation5], %s240_s16  ;;  %s153_s19 = scalar_lea.vmem [#allocation5], %s1143_s18  ;;  %v209_v39 = vadd.f32 %v208_v35, %v204_v34 }
  0x84   : > { %v242_v37 = vld [vmem:[%s241_s24] sm:$0x1]  ;;  %s246_s22 = scalar_lea.vmem [#allocation5], %s245_s3  ;;  %s1190_s5 = sld [smem:[#allocation3 + %s264_s2]] }
  0x85   : > { %v154_v38 = vld [vmem:[%s153_s19] sm:$0x1]  ;;  %s269_s9 = sadd.s32 6, %s1096_s15  ;;  %s212_s7 = scalar_lea.vmem [#allocation5], %s1167_s28 }
  0x86   : > { %v247_v40 = vld [vmem:[%s246_s22] sm:$0x1]  ;;  %s1194_s0 = sld [smem:[#allocation3 + %s269_s9]]  ;;  %s251_s16 = scalar_lea.vmem [#allocation5], %s250_s13  ;;  %v155_v44 = vadd.f32 %v154_v38, %v150_v36 }
  0x87   : > { %v213_v41 = vld [vmem:[%s212_s7] sm:$0x1]  ;;  %v248_v42 = vadd.f32 %v247_v40, %v242_v37  ;;  %s274_s25 = sadd.s32 7, %s1096_s15  ;;  %s256_s18 = scalar_lea.vmem [#allocation5], %s255_s21 }
  0x88   : > { %v252_v43 = vld [vmem:[%s251_s16] sm:$0x1]  ;;  %s1197_s3 = sld [smem:[#allocation3 + %s274_s25]]  ;;  %s279_s11 = sadd.s32 8, %s1096_s15  ;;  %v214_v48 = vadd.f32 %v213_v41, %v209_v39 }
  0x89   : > { %v253_v45 = vadd.f32 %v252_v43, %v248_v42  ;;  %v257_v46 = vld [vmem:[%s256_s18] sm:$0x1]  ;;  %s158_s28 = scalar_lea.vmem [#allocation5], %s1145_s30  ;;  %s1201_s27 = sld [smem:[#allocation3 + %s279_s11]] }
  0x8a   : > { %v159_v47 = vld [vmem:[%s158_s28] sm:$0x1]  ;;  %s217_s13 = scalar_lea.vmem [#allocation5], %s1170_s29  ;;  %s261_s8 = scalar_lea.vmem [#allocation5], %s1186_s26 }
  0x8b   : > { %v218_v49 = vld [vmem:[%s217_s13] sm:$0x1]  ;;  %v258_v50 = vadd.f32 %v257_v46, %v253_v45  ;;  %s284_s21 = sadd.s32 9, %s1096_s15  ;;  %s1207_s24 = sld [smem:[#allocation3 + %s1100_s20]]  ;;  %v160_v52 = vadd.f32 %v159_v47, %v155_v44 }
  0x8c   : > { %v262_v51 = vld [vmem:[%s261_s8] sm:$0x1]  ;;  %s1209_s2 = sld [smem:[#allocation3 + %s284_s21]]  ;;  %s266_s30 = scalar_lea.vmem [#allocation5], %s1190_s5  ;;  %v219_v56 = vadd.f32 %v218_v49, %v214_v48 }
  0x8d   : > { %v263_v53 = vadd.f32 %v262_v51, %v258_v50  ;;  %v267_v54 = vld [vmem:[%s266_s30] sm:$0x1]  ;;  %s303_s19 = sadd.s32 1, %s1100_s20  ;;  %s163_s29 = scalar_lea.vmem [#allocation5], %s1148_s1 }
  0x8e   : > { %v164_v55 = vld [vmem:[%s163_s29] sm:$0x1]  ;;  %s271_s26 = scalar_lea.vmem [#allocation5], %s1194_s0  ;;  %s1215_s22 = sld [smem:[#allocation3 + %s303_s19]] }
  0x8f   : > { %v272_v57 = vld [vmem:[%s271_s26] sm:$0x1]  ;;  %s308_s15 = sadd.s32 2, %s1100_s20  ;;  %s222_s9 = scalar_lea.vmem [#allocation5], %s1174_s6  ;;  %v268_v59 = vadd.f32 %v267_v54, %v263_v53  ;;  %v165_v61 = vadd.f32 %v164_v55, %v160_v52 }
  0x90   : > { %v223_v58 = vld [vmem:[%s222_s9] sm:$0x1]  ;;  %s1219_s7 = sld [smem:[#allocation3 + %s308_s15]]  ;;  %s276_s5 = scalar_lea.vmem [#allocation5], %s1197_s3 }
  0x91   : > { %v277_v60 = vld [vmem:[%s276_s5] sm:$0x1]  ;;  %s313_s1 = sadd.s32 3, %s1100_s20  ;;  %v273_v62 = vadd.f32 %v272_v57, %v268_v59  ;;  %s168_s16 = scalar_lea.vmem [#allocation5], %s1151_s4  ;;  %v224_v0 = vadd.f32 %v223_v58, %v219_v56 }
  0x92   : > { %s1223_s0 = sld [smem:[#allocation3 + %s313_s1]]  ;;  %v169_v63 = vld [vmem:[%s168_s16] sm:$0x1]  ;;  %s281_s6 = scalar_lea.vmem [#allocation5], %s1201_s27 }
  0x93   : > { %v282_v1 = vld [vmem:[%s281_s6] sm:$0x1]  ;;  %s318_s25 = sadd.s32 4, %s1100_s20  ;;  %s227_s18 = scalar_lea.vmem [#allocation5], %s1176_s17  ;;  %v278_v3 = vadd.f32 %v277_v60, %v273_v62  ;;  %v170_v5 = vadd.f32 %v169_v63, %v165_v61 }
  0x94   : > { %v228_v2 = vld [vmem:[%s227_s18] sm:$0x1]  ;;  %s300_s3 = scalar_lea.vmem [#allocation5], %s1207_s24  ;;  %s1230_s11 = sld [smem:[#allocation3 + %s318_s25]] }
  0x95   : > { %v301_v4 = vld [vmem:[%s300_s3] sm:$0x1]  ;;  %s323_s28 = sadd.s32 5, %s1100_s20  ;;  %v283_v6 = vadd.f32 %v282_v1, %v278_v3  ;;  %s286_s4 = scalar_lea.vmem [#allocation5], %s1209_s2  ;;  %v229_v9 = vadd.f32 %v228_v2, %v224_v0 }
  0x96   : > { %s1233_s13 = sld [smem:[#allocation3 + %s323_s28]]  ;;  %v287_v7 = vld [vmem:[%s286_s4] sm:$0x1]  ;;  %s305_s27 = scalar_lea.vmem [#allocation5], %s1215_s22 }
  0x97   : > { %v306_v8 = vld [vmem:[%s305_s27] sm:$0x1]  ;;  %s328_s8 = sadd.s32 6, %s1100_s20  ;;  %s310_s17 = scalar_lea.vmem [#allocation5], %s1219_s7  ;;  %v288_v13 = vadd.f32 %v287_v7, %v283_v6 }
  0x98   : > { %v307_v10 = vadd.f32 %v306_v8, %v301_v4  ;;  %v311_v11 = vld [vmem:[%s310_s17] sm:$0x1]  ;;  %s1239_s21 = sld [smem:[#allocation3 + %s328_s8]]  ;;  %s333_s24 = sadd.s32 7, %s1100_s20 }
  0x99   : > { %s757_s30 = spop %756  ;;  %s315_s2 = scalar_lea.vmem [#allocation5], %s1223_s0 }
  0x9a   : > { %v176_v12 = vstv %s757_s30  ;;  %s759_s19 = spop %758  ;;  %v312_v14 = vadd.f32 %v311_v11, %v307_v10  ;;  %v316_v15 = vld [vmem:[%s315_s2] sm:$0x1]  ;;  %s334_s29 = sld [smem:[#allocation3 + %s333_s24]] }
  0x9b   : > { %v177_v16 = vmul.f32 %v176_v12, %v170_v5  ;;  %v235_v17 = vstv %s759_s19  ;;  %s338_s26 = sadd.s32 8, %s1100_s20  ;;  %s320_s15 = scalar_lea.vmem [#allocation5], %s1230_s11 }
  0x9c   : > { %v236_v18 = vmul.f32 %v235_v17, %v229_v9  ;;  %s761_s22 = spop %760  ;;  %v317_v19 = vadd.f32 %v316_v15, %v312_v14  ;;  %v321_v20 = vld [vmem:[%s320_s15] sm:$0x1]  ;;  %s1246_s9 = scalar_lea.vmem [#allocation8], %s1112_s14 }
  0x9d   : > { %178 = vst [vmem:[%s1246_s9] sm:$0x1] %v177_v16  ;;  %v294_v21 = vstv %s761_s22  ;;  %s325_s7 = scalar_lea.vmem [#allocation5], %s1233_s13  ;;  %s339_s5 = sld [smem:[#allocation3 + %s338_s26]] }
  0x9e   : > { %v326_v22 = vld [vmem:[%s325_s7] sm:$0x1]  ;;  %s343_s1 = sadd.s32 9, %s1100_s20  ;;  %237 = vst [vmem:[%s1246_s9 + $0x1] sm:$0x1] %v236_v18  ;;  %v295_v23 = vmul.f32 %v294_v21, %v288_v13  ;;  %v322_v24 = vadd.f32 %v321_v20, %v317_v19  ;;  %s330_s16 = scalar_lea.vmem [#allocation5], %s1239_s21 }
  0x9f   : > { %s344_s0 = sld [smem:[#allocation3 + %s343_s1]]  ;;  %v331_v25 = vld [vmem:[%s330_s16] sm:$0x1]  ;;  %s1253_s14 = spop %762 }
  0xa0   : > { %s358_s6 = sld [smem:[#allocation3 + %s1102_s23]]  ;;  %296 = vst [vmem:[%s1246_s9 + $0x2] sm:$0x1] %v295_v23  ;;  %v327_v26 = vadd.f32 %v326_v22, %v322_v24  ;;  %s362_s25 = sadd.s32 1, %s1102_s23  ;;  %v353_v34 = vstv %s1253_s14 }
  0xa1   : > { %s335_s18 = scalar_lea.vmem [#allocation5], %s334_s29  ;;  %s363_s3 = sld [smem:[#allocation3 + %s362_s25]] }
  0xa2   : > { %v336_v27 = vld [vmem:[%s335_s18] sm:$0x1]  ;;  %s367_s11 = sadd.s32 2, %s1102_s23  ;;  %v332_v28 = vadd.f32 %v331_v25, %v327_v26  ;;  %s372_s28 = sadd.s32 3, %s1102_s23 }
  0xa3   : > { %s368_s20 = sld [smem:[#allocation3 + %s367_s11]]  ;;  %s340_s4 = scalar_lea.vmem [#allocation5], %s339_s5 }
  0xa4   : > { %s373_s13 = sld [smem:[#allocation3 + %s372_s28]]  ;;  %v337_v29 = vadd.f32 %v336_v27, %v332_v28  ;;  %v341_v30 = vld [vmem:[%s340_s4] sm:$0x1]  ;;  %s377_s27 = sadd.s32 4, %s1102_s23 }
  0xa5   : > { %s345_s8 = scalar_lea.vmem [#allocation5], %s344_s0  ;;  %s378_s17 = sld [smem:[#allocation3 + %s377_s27]] }
  0xa6   : > { %v346_v31 = vld [vmem:[%s345_s8] sm:$0x1]  ;;  %v342_v32 = vadd.f32 %v341_v30, %v337_v29  ;;  %s359_s21 = scalar_lea.vmem [#allocation5], %s358_s6  ;;  %s382_s24 = sadd.s32 5, %s1102_s23 }
  0xa7   : > { %v360_v33 = vld [vmem:[%s359_s21] sm:$0x1]  ;;  %s387_s30 = sadd.s32 6, %s1102_s23  ;;  %s383_s19 = sld [smem:[#allocation3 + %s382_s24]] }
  0xa8   : > { %v347_v35 = vadd.f32 %v346_v31, %v342_v32  ;;  %s364_s2 = scalar_lea.vmem [#allocation5], %s363_s3  ;;  %s388_s29 = sld [smem:[#allocation3 + %s387_s30]] }
  0xa9   : > { %v365_v36 = vld [vmem:[%s364_s2] sm:$0x1]  ;;  %s369_s26 = scalar_lea.vmem [#allocation5], %s368_s20  ;;  %s392_s22 = sadd.s32 7, %s1102_s23 }
  0xaa   : > { %v366_v37 = vadd.f32 %v365_v36, %v360_v33  ;;  %v370_v38 = vld [vmem:[%s369_s26] sm:$0x1]  ;;  %v354_v39 = vmul.f32 %v353_v34, %v347_v35  ;;  %s374_s15 = scalar_lea.vmem [#allocation5], %s373_s13  ;;  %s393_s7 = sld [smem:[#allocation3 + %s392_s22]] }
  0xab   : > { %v375_v40 = vld [vmem:[%s374_s15] sm:$0x1]  ;;  %s397_s5 = sadd.s32 8, %s1102_s23  ;;  %s379_s0 = scalar_lea.vmem [#allocation5], %s378_s17 }
  0xac   : > { %v371_v41 = vadd.f32 %v370_v38, %v366_v37  ;;  %s398_s1 = sld [smem:[#allocation3 + %s397_s5]]  ;;  %355 = vst [vmem:[%s1246_s9 + $0x3] sm:$0x1] %v354_v39  ;;  %v380_v42 = vld [vmem:[%s379_s0] sm:$0x1]  ;;  %s402_s16 = sadd.s32 9, %s1102_s23 }
  0xad   : > { %s1268_s14 = spop %764  ;;  %s403_s6 = sld [smem:[#allocation3 + %s402_s16]] }
  0xae   : > { %v376_v43 = vadd.f32 %v375_v40, %v371_v41  ;;  %s384_s25 = scalar_lea.vmem [#allocation5], %s383_s19  ;;  %s417_s18 = sld [smem:[#allocation3 + %s1105_s10]]  ;;  %v412_v56 = vstv %s1268_s14 }
  0xaf   : > { %v385_v44 = vld [vmem:[%s384_s25] sm:$0x1]  ;;  %s421_s3 = sadd.s32 1, %s1105_s10  ;;  %s426_s11 = sadd.s32 2, %s1105_s10 }
  0xb0   : > { %v381_v45 = vadd.f32 %v380_v42, %v376_v43  ;;  %s389_s20 = scalar_lea.vmem [#allocation5], %s388_s29  ;;  %s422_s28 = sld [smem:[#allocation3 + %s421_s3]] }
  0xb1   : > { %v390_v46 = vld [vmem:[%s389_s20] sm:$0x1]  ;;  %s427_s13 = sld [smem:[#allocation3 + %s426_s11]]  ;;  %s394_s23 = scalar_lea.vmem [#allocation5], %s393_s7 }
  0xb2   : > { %v386_v47 = vadd.f32 %v385_v44, %v381_v45  ;;  %v395_v48 = vld [vmem:[%s394_s23] sm:$0x1]  ;;  %s431_s4 = sadd.s32 3, %s1105_s10  ;;  %s436_s27 = sadd.s32 4, %s1105_s10 }
  0xb3   : > { %s432_s8 = sld [smem:[#allocation3 + %s431_s4]]  ;;  %s399_s17 = scalar_lea.vmem [#allocation5], %s398_s1 }
  0xb4   : > { %v391_v49 = vadd.f32 %v390_v46, %v386_v47  ;;  %v400_v50 = vld [vmem:[%s399_s17] sm:$0x1]  ;;  %s437_s21 = sld [smem:[#allocation3 + %s436_s27]]  ;;  %s418_s24 = scalar_lea.vmem [#allocation5], %s417_s18 }
  0xb5   : > { %v419_v52 = vld [vmem:[%s418_s24] sm:$0x1]  ;;  %s441_s30 = sadd.s32 5, %s1105_s10  ;;  %s446_s19 = sadd.s32 6, %s1105_s10 }
  0xb6   : > { %v396_v51 = vadd.f32 %v395_v48, %v391_v49  ;;  %s404_s2 = scalar_lea.vmem [#allocation5], %s403_s6  ;;  %s442_s29 = sld [smem:[#allocation3 + %s441_s30]] }
  0xb7   : > { %v405_v53 = vld [vmem:[%s404_s2] sm:$0x1]  ;;  %s423_s26 = scalar_lea.vmem [#allocation5], %s422_s28  ;;  %s447_s22 = sld [smem:[#allocation3 + %s446_s19]] }
  0xb8   : > { %v401_v54 = vadd.f32 %v400_v50, %v396_v51  ;;  %v424_v55 = vld [vmem:[%s423_s26] sm:$0x1]  ;;  %s428_s15 = scalar_lea.vmem [#allocation5], %s427_s13  ;;  %s451_s7 = sadd.s32 7, %s1105_s10 }
  0xb9   : > { %v425_v57 = vadd.f32 %v424_v55, %v419_v52  ;;  %v429_v58 = vld [vmem:[%s428_s15] sm:$0x1]  ;;  %s456_s5 = sadd.s32 8, %s1105_s10  ;;  %s452_s1 = sld [smem:[#allocation3 + %s451_s7]] }
  0xba   : > { %v406_v59 = vadd.f32 %v405_v53, %v401_v54  ;;  %s433_s0 = scalar_lea.vmem [#allocation5], %s432_s8  ;;  %s457_s16 = sld [smem:[#allocation3 + %s456_s5]] }
  0xbb   : > { %v430_v60 = vadd.f32 %v429_v58, %v425_v57  ;;  %v434_v61 = vld [vmem:[%s433_s0] sm:$0x1]  ;;  %s438_s6 = scalar_lea.vmem [#allocation5], %s437_s21  ;;  %s461_s25 = sadd.s32 9, %s1105_s10 }
  0xbc   : > { %v413_v62 = vmul.f32 %v412_v56, %v406_v59  ;;  %v439_v63 = vld [vmem:[%s438_s6] sm:$0x1]  ;;  %s1281_s14 = spop %766  ;;  %s462_s18 = sld [smem:[#allocation3 + %s461_s25]] }
  0xbd   : > { %v435_v0 = vadd.f32 %v434_v61, %v430_v60  ;;  %s443_s3 = scalar_lea.vmem [#allocation5], %s442_s29  ;;  %s476_s11 = sld [smem:[#allocation3 + %s1108_s12]]  ;;  %v471_v13 = vstv %s1281_s14 }
  0xbe   : > { %414 = vst [vmem:[%s1246_s9 + $0x4] sm:$0x1] %v413_v62  ;;  %v444_v1 = vld [vmem:[%s443_s3] sm:$0x1]  ;;  %s480_s20 = sadd.s32 1, %s1108_s12  ;;  %s485_s28 = sadd.s32 2, %s1108_s12 }
  0xbf   : > { %v440_v2 = vadd.f32 %v439_v63, %v435_v0  ;;  %s448_s13 = scalar_lea.vmem [#allocation5], %s447_s22  ;;  %s481_s23 = sld [smem:[#allocation3 + %s480_s20]] }
  0xc0   : > { %v449_v3 = vld [vmem:[%s448_s13] sm:$0x1]  ;;  %s486_s10 = sld [smem:[#allocation3 + %s485_s28]]  ;;  %s453_s4 = scalar_lea.vmem [#allocation5], %s452_s1 }
  0xc1   : > { %v445_v4 = vadd.f32 %v444_v1, %v440_v2  ;;  %v454_v5 = vld [vmem:[%s453_s4] sm:$0x1]  ;;  %s490_s27 = sadd.s32 3, %s1108_s12  ;;  %s495_s8 = sadd.s32 4, %s1108_s12 }
  0xc2   : > { %s491_s17 = sld [smem:[#allocation3 + %s490_s27]]  ;;  %s458_s21 = scalar_lea.vmem [#allocation5], %s457_s16 }
  0xc3   : > { %v450_v6 = vadd.f32 %v449_v3, %v445_v4  ;;  %v459_v7 = vld [vmem:[%s458_s21] sm:$0x1]  ;;  %s496_s24 = sld [smem:[#allocation3 + %s495_s8]]  ;;  %s477_s30 = scalar_lea.vmem [#allocation5], %s476_s11 }
  0xc4   : > { %v478_v9 = vld [vmem:[%s477_s30] sm:$0x1]  ;;  %s500_s19 = sadd.s32 5, %s1108_s12  ;;  %s505_s2 = sadd.s32 6, %s1108_s12 }
  0xc5   : > { %v455_v8 = vadd.f32 %v454_v5, %v450_v6  ;;  %s463_s29 = scalar_lea.vmem [#allocation5], %s462_s18  ;;  %s501_s26 = sld [smem:[#allocation3 + %s500_s19]] }
  0xc6   : > { %v464_v10 = vld [vmem:[%s463_s29] sm:$0x1]  ;;  %s482_s22 = scalar_lea.vmem [#allocation5], %s481_s23  ;;  %s506_s15 = sld [smem:[#allocation3 + %s505_s2]] }
  0xc7   : > { %v460_v11 = vadd.f32 %v459_v7, %v455_v8  ;;  %v483_v12 = vld [vmem:[%s482_s22] sm:$0x1]  ;;  %s487_s7 = scalar_lea.vmem [#allocation5], %s486_s10  ;;  %s510_s5 = sadd.s32 7, %s1108_s12 }
  0xc8   : > { %v484_v14 = vadd.f32 %v483_v12, %v478_v9  ;;  %v488_v15 = vld [vmem:[%s487_s7] sm:$0x1]  ;;  %s515_s1 = sadd.s32 8, %s1108_s12  ;;  %s1401_s0 = sld [smem:[#allocation21_spill]] }
  0xc9   : > { %v465_v16 = vadd.f32 %v464_v10, %v460_v11  ;;  %s511_s16 = sld [smem:[#allocation3 + %s510_s5]]  ;;  %s492_s6 = scalar_lea.vmem [#allocation5], %s491_s17 }
  0xca   : > { %v489_v17 = vadd.f32 %v488_v15, %v484_v14  ;;  %v493_v18 = vld [vmem:[%s492_s6] sm:$0x1]  ;;  %s516_s25 = sld [smem:[#allocation3 + %s515_s1]]  ;;  %s497_s18 = scalar_lea.vmem [#allocation5], %s496_s24 }
  0xcb   : > { %v472_v19 = vmul.f32 %v471_v13, %v465_v16  ;;  %v498_v20 = vld [vmem:[%s497_s18] sm:$0x1]  ;;  %s520_s3 = sadd.s32 9, %s1108_s12  ;;  %s1295_s14 = spop %768 }
  0xcc   : > { %v494_v21 = vadd.f32 %v493_v18, %v489_v17  ;;  %s521_s11 = sld [smem:[#allocation3 + %s520_s3]]  ;;  %s502_s20 = scalar_lea.vmem [#allocation5], %s501_s26  ;;  %v530_v34 = vstv %s1295_s14 }
  0xcd   : > { %473 = vst [vmem:[%s1246_s9 + $0x5] sm:$0x1] %v472_v19  ;;  %v503_v22 = vld [vmem:[%s502_s20] sm:$0x1]  ;;  %s507_s10 = scalar_lea.vmem [#allocation5], %s506_s15 }
  0xce   : > { %s535_s28 = sld [smem:[#allocation3 + %s1401_s0]]  ;;  %v499_v23 = vadd.f32 %v498_v20, %v494_v21  ;;  %s539_s13 = sadd.s32 1, %s1401_s0  ;;  %v508_v24 = vld [vmem:[%s507_s10] sm:$0x1] }
  0xcf   : > { %s544_s23 = sadd.s32 2, %s1401_s0  ;;  %s540_s4 = sld [smem:[#allocation3 + %s539_s13]] }
  0xd0   : > { %v504_v25 = vadd.f32 %v503_v22, %v499_v23  ;;  %s545_s12 = sld [smem:[#allocation3 + %s544_s23]]  ;;  %s512_s27 = scalar_lea.vmem [#allocation5], %s511_s16 }
  0xd1   : > { %v513_v26 = vld [vmem:[%s512_s27] sm:$0x1]  ;;  %s549_s8 = sadd.s32 3, %s1401_s0  ;;  %s554_s17 = sadd.s32 4, %s1401_s0 }
  0xd2   : > { %v509_v27 = vadd.f32 %v508_v24, %v504_v25  ;;  %s550_s21 = sld [smem:[#allocation3 + %s549_s8]]  ;;  %s517_s24 = scalar_lea.vmem [#allocation5], %s516_s25 }
  0xd3   : > { %v518_v28 = vld [vmem:[%s517_s24] sm:$0x1]  ;;  %s555_s30 = sld [smem:[#allocation3 + %s554_s17]]  ;;  %s559_s2 = sadd.s32 5, %s1401_s0 }
  0xd4   : > { %v514_v29 = vadd.f32 %v513_v26, %v509_v27  ;;  %s536_s19 = scalar_lea.vmem [#allocation5], %s535_s28  ;;  %s564_s29 = sadd.s32 6, %s1401_s0 }
  0xd5   : > { %v537_v30 = vld [vmem:[%s536_s19] sm:$0x1]  ;;  %s522_s26 = scalar_lea.vmem [#allocation5], %s521_s11  ;;  %s560_s22 = sld [smem:[#allocation3 + %s559_s2]] }
  0xd6   : > { %v523_v31 = vld [vmem:[%s522_s26] sm:$0x1]  ;;  %v519_v32 = vadd.f32 %v518_v28, %v514_v29  ;;  %s541_s15 = scalar_lea.vmem [#allocation5], %s540_s4  ;;  %s565_s7 = sld [smem:[#allocation3 + %s564_s29]] }
  0xd7   : > { %v542_v33 = vld [vmem:[%s541_s15] sm:$0x1]  ;;  %s546_s5 = scalar_lea.vmem [#allocation5], %s545_s12  ;;  %s569_s1 = sadd.s32 7, %s1401_s0 }
  0xd8   : > { %v543_v35 = vadd.f32 %v542_v33, %v537_v30  ;;  %v547_v36 = vld [vmem:[%s546_s5] sm:$0x1]  ;;  %s574_s16 = sadd.s32 8, %s1401_s0  ;;  %v524_v37 = vadd.f32 %v523_v31, %v519_v32  ;;  %s570_s6 = sld [smem:[#allocation3 + %s569_s1]] }
  0xd9   : > { %s551_s25 = scalar_lea.vmem [#allocation5], %s550_s21  ;;  %s575_s18 = sld [smem:[#allocation3 + %s574_s16]] }
  0xda   : > { %v548_v38 = vadd.f32 %v547_v36, %v543_v35  ;;  %v552_v39 = vld [vmem:[%s551_s25] sm:$0x1]  ;;  %v531_v40 = vmul.f32 %v530_v34, %v524_v37  ;;  %s556_s3 = scalar_lea.vmem [#allocation5], %s555_s30  ;;  %s579_s11 = sadd.s32 9, %s1401_s0 }
  0xdb   : > { %v557_v41 = vld [vmem:[%s556_s3] sm:$0x1]  ;;  %s580_s20 = sld [smem:[#allocation3 + %s579_s11]]  ;;  %s561_s14 = scalar_lea.vmem [#allocation5], %s560_s22 }
  0xdc   : > { %v553_v42 = vadd.f32 %v552_v39, %v548_v38  ;;  %532 = vst [vmem:[%s1246_s9 + $0x6] sm:$0x1] %v531_v40  ;;  %v562_v43 = vld [vmem:[%s561_s14] sm:$0x1]  ;;  %s1402_s28 = sld [smem:[#allocation16_spill]]  ;;  %s566_s13 = scalar_lea.vmem [#allocation5], %s565_s7 }
  0xdd   : > { %v567_v45 = vld [vmem:[%s566_s13] sm:$0x1]  ;;  %s1403_s10 = sld [smem:[#allocation13_spill]]  ;;  %s1404_s0 = sld [smem:[#allocation19_spill]] }
  0xde   : > { %v558_v44 = vadd.f32 %v557_v41, %v553_v42  ;;  %s571_s23 = scalar_lea.vmem [#allocation5], %s570_s6  ;;  %s771_s12 = spop %770 }
  0xdf   : > { %v572_v47 = vld [vmem:[%s571_s23] sm:$0x1]  ;;  %s576_s4 = scalar_lea.vmem [#allocation5], %s575_s18  ;;  %v589_v53 = vstv %s771_s12  ;;  %s606_s17 = sshll.u32 %s1246_s9, 4  ;;  %s1317_s17 = int_to_ptr.vmem [resolvable:$true] %s606_s17 }
  0xe0   : > { %v563_v46 = vadd.f32 %v562_v43, %v558_v44  ;;  %v577_v49 = vld [vmem:[%s576_s4] sm:$0x1]  ;;  %s1405_s30 = sld [smem:[#allocation23_spill]]  ;;  %s892_s26 = scalar_lea.vmem %s1317_s17, 128 }
  0xe1   : > { %s581_s27 = scalar_lea.vmem [#allocation5], %s580_s20  ;;  %p893_p13 = scmp.ne.s32.totalorder %s1317_s17, %s892_s26 }
  0xe2   : > { %v568_v48 = vadd.f32 %v567_v45, %v563_v46  ;;  %v582_v51 = vld [vmem:[%s581_s27] sm:$0x1]  ;;  %s753_s8 = sshll.u32 %s1402_s28, 7  ;;  %s967_s22 = smov [#allocation8]  }
  0xe3   : > { %s1406_s2 = sand.u32 1, %s1403_s10   ;;  %p1407_p0 = scmp.ne.s32.totalorder %s1404_s0, 0 }
  0xe4   : > { %v573_v50 = vadd.f32 %v572_v47, %v568_v48  ;;  %s593_s29 = scalar_lea.sflag [#allocation7], %s1406_s2  ;;  %s896_s15 = sshll.u32 %s967_s22, 4  ;;  %s897_s15 = int_to_ptr.vmem [resolvable:$false] %s896_s15 }
  0xe5   : > { %p894_p3 = pnand %p893_p13, %p1407_p0  ;;  %s898_s7 = scalar_lea.vmem %s897_s15, 256 }
  0xe6   : > { %v578_v52 = vadd.f32 %v577_v49, %v573_v50  ;;  %s1315_s19 = scalar_lea.hbm %s1405_s30, %s753_s8  ;;  %p899_p6 = scmp.lt.s32.totalorder %s1317_s17, %s897_s15 }
  0xe7   : > { %p895_p4 = pneg %p894_p3  ;;  %p900_p10 = scmp.lt.s32.totalorder %s898_s7, %s892_s26 }
  0xe8   : > { %v583_v54 = vadd.f32 %v582_v51, %v578_v52 }
  0xe9   : > { %p901_p11 = por %p900_p10, %p899_p6 }
  0xea   : > { %v590_v55 = vmul.f32 %v589_v53, %v583_v54 }
  0xeb   : > { %p902_p12 = pnand %p901_p11, %p895_p4 }
  0xec   : > { %591 = vst [vmem:[%s1246_s9 + $0x7] sm:$0x1] %v590_v55 }
  0xed   : > { %905 = shalt.err (!%p902_p12)
}
  0xee   : > { %s906_s9 = scalar_lea.hbm %s1315_s19, 128  ;;  %s910_s16 = scalar_lea.hbm %s1405_s30, 256 }
  0xef   : > { %p907_p1 = scmp.ne.s32.totalorder %s1315_s19, %s906_s9  ;;  %p911_p7 = scmp.lt.u32.totalorder %s1315_s19, %s1405_s30 }
  0xf0   : > { %p912_p9 = scmp.lt.u32.totalorder %s910_s16, %s906_s9  ;;  %p914_p13 = scmp.lt.u32.totalorder %s906_s9, %s1315_s19 }
  0xf1   : > { %p908_p2 = pnand %p907_p1, %p1407_p0 }
  0xf2   : > { %p913_p8 = por %p912_p9, %p911_p7 }
  0xf3   : > { %p909_p5 = pneg %p908_p2 }
  0xf4   : > { %p915_p3 = por %p914_p13, %p913_p8 }
  0xf6   : > { %p916_p4 = pnand %p915_p3, %p909_p5 }
  0xf8   : > { %919 = shalt.err (!%p916_p4)
}
  0xf9   : > { %776 = dma.vmem_to_hbm [thread:$0]  (%p1407_p0), %s1317_s17, 128, %s1315_s19, %s593_s29  }
  0xfa PF: > { %s1408_s18 = sld [smem:[#allocation15_spill]]  ;;  %s1409_s3 = sld [smem:[#allocation12_spill]] }
  0xfb   : > { %s1410_s11 = sld [smem:[#allocation20_spill]] }
 0x100   : > { %p788_p6 = scmp.ge.s32.totalorder %s1408_s18, 2  ;;  %s618_s20 = sand.u32 1, %s1409_s3  }
 0x101   : > { %p1411_p10 = scmp.ne.s32.totalorder %s1410_s11, 0  ;;  %s619_s14 = scalar_lea.sflag [#allocation7], %s618_s20 }
 0x103   : > { %p783_p11 = pnand %p788_p6, %p1411_p10 }
 0x105   : > { %943 = dma.done.wait (!%p783_p11), %s619_s14, 128  }
 0x106   : > { %945 = vsyncadd (!%p783_p11), %s619_s14, 4294967168  ;;  %s1412_s28 = sld [smem:[#allocation17_spill]]  ;;  %s1413_s0 = sld [smem:[#allocation13_spill]] }
 0x107   : > { %s1414_s27 = sld [smem:[#allocation14_spill]]  ;;  %s1415_s1 = sld [smem:[#allocation18_spill]] }
 0x10c   : > { %p22_p12 = scmp.ge.s32.totalorder %s1412_s28, 4  }
 0x10e   :  { %24 = sbr.rel (!%p22_p12) target bundleno = 27 (0x1b), region = 141 }
 0x115   :  { %624 = vsyncpa [#allocation6], 1 }
 0x116   :  { %626 = vsyncpa [#allocation6 + $0x1], 1 }
 0x117   :  { %627 = vsyncpa [#allocation7], 1 }
 0x118   :  { %629 = vsyncpa [#allocation7 + $0x1], 1 }

</bundles_post_ra>
